<compile_context>
chip_gen: v6e
topology: v6e:2x2x1
jax: 0.10.0
libtpu: 0.0.40
codegen_flags: <defaults>
</compile_context>

<pallas_src>
import functools

import jax
import jax.numpy as jnp
import numpy as np
from jax.experimental import pallas as pl
from jax.experimental.pallas import tpu as pltpu

EPS = 1e-5  # torch.nn.InstanceNorm2d default


def _reflect_taps(v, w_first, w_last, H, W):
    """Yields (tap_index, tap) for the 9 taps of a 3x3 conv with reflect pad 1.

    v       : (C, H*W) f32, channels-first, row-major flattened spatial dim.
    w_first : (C, H*W) bool, lanes where w == 0.
    w_last  : (C, H*W) bool, lanes where w == W-1.
    tap[c, h*W + w] == x_reflect_padded[c, h + dh, w + dw].
    """
    HW = H * W

    def shift_h(x, s):          # -> x[c, reflect(h+s), w]
        if s == 0:
            return x
        if s == -1:             # rows [1, 0, 1, ..., H-2]
            return jnp.concatenate([x[:, W:2 * W], x[:, :(H - 1) * W]], axis=1)
        # s == +1               # rows [1, 2, ..., H-1, H-2]
        return jnp.concatenate([x[:, W:], x[:, (H - 2) * W:(H - 1) * W]], axis=1)

    def shift_w(x, s):          # -> x[c, h, reflect(w+s)]
        if s == 0:
            return x
        # Lane-shifted copies; row-boundary lanes are fixed with a select.
        back = jnp.concatenate([x[:, :1], x[:, :HW - 1]], axis=1)  # out[p] = x[p-1]
        fwd = jnp.concatenate([x[:, 1:], x[:, HW - 1:]], axis=1)   # out[p] = x[p+1]
        if s == -1:             # w>=1 -> w-1 ; w==0 -> 1
            return jnp.where(w_first, fwd, back)
        # s == +1               # w<=W-2 -> w+1 ; w==W-1 -> W-2
        return jnp.where(w_last, back, fwd)

    for dh in range(3):
        xh = shift_h(v, dh - 1)
        for dw in range(3):
            yield dh * 3 + dw, shift_w(xh, dw - 1)


def _conv3x3_instnorm(v, w_ref, b_ref, w_first, w_last, H, W):
    """Reflect-pad(1) 3x3 conv + bias + InstanceNorm2d(affine=False).

    v      : (C, H*W) f32
    w_ref  : Ref (9, C_out, C_in) bf16, tap-major
    b_ref  : Ref (C_out, 1) f32
    returns (C_out, H*W) f32
    """
    acc = None
    for t, tap in _reflect_taps(v, w_first, w_last, H, W):
        # 9 accumulating MXU dots (no im2col buffer); bf16 operands, f32 acc.
        part = jnp.dot(w_ref[t], tap.astype(jnp.bfloat16),
                       preferred_element_type=jnp.float32)
        acc = part if acc is None else acc + part
    y = acc + b_ref[...]                                    # (C, HW)

    # Two-pass InstanceNorm stats (better conditioned than E[y^2] - mean^2).
    mean = jnp.mean(y, axis=1, keepdims=True)
    d = y - mean
    var = jnp.mean(d * d, axis=1, keepdims=True)
    return d * jax.lax.rsqrt(var + EPS)


def _resnet_block_kernel(H, W, x_ref, w1_ref, b1_ref, w2_ref, b2_ref, o_ref):
    HW = H * W
    C = x_ref.shape[1]

    # w-coordinate boundary masks in flattened (h*W + w) lane order.  Built
    # without vector div/mod (not reliably lowered on the VPU) and at full
    # (C, HW) shape so no i1 sublane-broadcast is needed inside the selects.
    p = jax.lax.broadcasted_iota(jnp.int32, (C, HW), 1)
    lane_w = p
    for h in range(1, H):
        lane_w = jnp.where(p >= h * W, p - h * W, lane_w)
    w_first = lane_w == 0
    w_last = lane_w == W - 1

    h1 = _conv3x3_instnorm(x_ref[0], w1_ref, b1_ref, w_first, w_last, H, W)
    h1 = jnp.maximum(h1, 0.0)                               # ReLU(inplace=True)
    h2 = _conv3x3_instnorm(h1, w2_ref, b2_ref, w_first, w_last, H, W)

    # Residual add: re-read the input block (still resident in VMEM) instead of
    # holding it live across both conv stages.
    o_ref[0] = (x_ref[0] + h2).astype(o_ref.dtype)


def resnet_block_pallas(x_nchw, w1_oihw, b1, w2_oihw, b2):
    """x: (N, C, H, W) f32; w: (C_out, C_in, 3, 3) PyTorch OIHW; b: (C,)."""
    x_nchw = x_nchw.astype(jnp.float32)
    N, C, H, W = x_nchw.shape
    assert H >= 2 and W >= 2, "ReflectionPad2d(1) needs spatial dims >= 2"
    HW = H * W

    # Channels-first flat layout: a free reshape, NOT a transpose (no extra HBM pass).
    x = x_nchw.reshape(N, C, HW)

    def pack_w(w):  # (C_out, C_in, 3, 3) -> (9, C_out, C_in), tap-major, bf16
        return jnp.transpose(w, (2, 3, 0, 1)).reshape(9, C, C).astype(jnp.bfloat16)

    w1m, w2m = pack_w(w1_oihw), pack_w(w2_oihw)
    b1r = b1.reshape(C, 1).astype(jnp.float32)
    b2r = b2.reshape(C, 1).astype(jnp.float32)

    # VMEM budget: double-buffered in/out blocks + resident params + headroom
    # for the in-kernel tap/accumulator temporaries (which scale with C*HW).
    block_bytes = C * HW * 4
    param_bytes = 2 * (9 * C * C * 2 + C * 4)
    vmem_needed = 4 * block_bytes + 2 * param_bytes + 10 * block_bytes + (2 << 20)
    vmem_limit = int(min(100 << 20, max(32 << 20, vmem_needed)))

    cost = pl.CostEstimate(
        flops=2 * 2 * N * HW * 9 * C * C,       # two 3x3 convs, 2 flops / MAC
        transcendentals=2 * N * C,              # one rsqrt per channel per stage
        bytes_accessed=2 * N * C * HW * 4 + param_bytes,
    )

    out_flat = pl.pallas_call(
        functools.partial(_resnet_block_kernel, H, W),
        out_shape=jax.ShapeDtypeStruct((N, C, HW), jnp.float32),
        grid=(N,),
        in_specs=[
            pl.BlockSpec((1, C, HW), lambda n: (n, 0, 0)),
            pl.BlockSpec((9, C, C), lambda n: (0, 0, 0)),   # grid-invariant -> resident
            pl.BlockSpec((C, 1), lambda n: (0, 0)),
            pl.BlockSpec((9, C, C), lambda n: (0, 0, 0)),
            pl.BlockSpec((C, 1), lambda n: (0, 0)),
        ],
        out_specs=pl.BlockSpec((1, C, HW), lambda n: (n, 0, 0)),
        compiler_params=pltpu.CompilerParams(
            dimension_semantics=("parallel",),
            vmem_limit_bytes=vmem_limit),
        cost_estimate=cost,
    )(x, w1m, b1r, w2m, b2r)

    # Free reshape back to NCHW (channels are already leading -- no transpose).
    return out_flat.reshape(N, C, H, W)


def _reference(x_nchw, w1, b1, w2, b2):
    """Pure-JAX reference mirroring the PyTorch module with the kernel's
    numerics contract (bf16 conv operands, f32 accumulation)."""
    x = x_nchw.astype(jnp.float32)

    def conv_in(inp, w, b):
        p = jnp.pad(inp, ((0, 0), (0, 0), (1, 1), (1, 1)), mode="reflect")
        y = jax.lax.conv_general_dilated(
            p.astype(jnp.bfloat16), w.astype(jnp.bfloat16), (1, 1), "VALID",
            dimension_numbers=("NCHW", "OIHW", "NCHW"),
            preferred_element_type=jnp.float32,
        ) + b.reshape(1, -1, 1, 1)
        m = y.mean(axis=(2, 3), keepdims=True)
        v = ((y - m) ** 2).mean(axis=(2, 3), keepdims=True)
        return (y - m) * jax.lax.rsqrt(v + EPS)

    h = jax.nn.relu(conv_in(x, w1, b1))
    return x + conv_in(h, w2, b2)


if __name__ == "__main__":
    N, C, H, W = 2, 4, 16, 16
    key = jax.random.PRNGKey(0)
    kx, k1, k2, k3, k4 = jax.random.split(key, 5)

    x = jax.random.normal(kx, (N, C, H, W), dtype=jnp.float32)
    # Conv2d(features, features, 3) params in PyTorch OIHW layout.
    fan_in = C * 3 * 3
    bound = 1.0 / np.sqrt(fan_in)
    w1 = jax.random.uniform(k1, (C, C, 3, 3), jnp.float32, -bound, bound)
    b1 = jax.random.uniform(k2, (C,), jnp.float32, -bound, bound)
    w2 = jax.random.uniform(k3, (C, C, 3, 3), jnp.float32, -bound, bound)
    b2 = jax.random.uniform(k4, (C,), jnp.float32, -bound, bound)

    out = jax.block_until_ready(jax.jit(resnet_block_pallas)(x, w1, b1, w2, b2))
    ref = jax.block_until_ready(_reference(x, w1, b1, w2, b2))

    assert out.shape == (N, C, H, W)
    # Tolerance covers bf16 re-rounding of the intermediate activation at the
    # second conv boundary (kernel vs reference may round near-ties differently).
    np.testing.assert_allclose(np.asarray(out), np.asarray(ref),
                               rtol=1e-2, atol=1e-2)

    print("KERNEL_OK")
</pallas_src>

<mosaic_0001>
module attributes {stable_mosaic.version = 11 : i64} {
  func.func @_resnet_block_kernel(%arg0: i32, %arg1: memref<1x4x256xf32, #tpu.memory_space<vmem>>, %arg2: memref<9x4x4xbf16, #tpu.memory_space<vmem>>, %arg3: memref<4x1xf32, #tpu.memory_space<vmem>>, %arg4: memref<9x4x4xbf16, #tpu.memory_space<vmem>>, %arg5: memref<4x1xf32, #tpu.memory_space<vmem>>, %arg6: memref<1x4x256xf32, #tpu.memory_space<vmem>>) attributes {dimension_semantics = [#tpu.dimension_semantics<parallel>], iteration_bounds = array<i64: 2>, scalar_prefetch = 0 : i64, scratch_operands = 0 : i64, tpu.core_type = #tpu.core_type<tc>, window_params = [{transform_indices = @transform_0, window_bounds = array<i64: 1, 4, 256>}, {pipeline_mode = #tpu.pipeline_mode<synchronous>, transform_indices = @transform_1, window_bounds = array<i64: 9, 4, 4>}, {pipeline_mode = #tpu.pipeline_mode<synchronous>, transform_indices = @transform_2, window_bounds = array<i64: 4, 1>}, {pipeline_mode = #tpu.pipeline_mode<synchronous>, transform_indices = @transform_3, window_bounds = array<i64: 9, 4, 4>}, {pipeline_mode = #tpu.pipeline_mode<synchronous>, transform_indices = @transform_4, window_bounds = array<i64: 4, 1>}, {transform_indices = @transform_5, window_bounds = array<i64: 1, 4, 256>}]} {
    %0 = tpu.iota {dimensions = array<i32: 1>} : vector<4x256xi32>
    %c16_i32 = arith.constant 16 : i32
    %1 = vector.broadcast %c16_i32 : i32 to vector<4x256xi32>
    %2 = arith.cmpi sge, %0, %1 : vector<4x256xi32>
    %c16_i32_0 = arith.constant 16 : i32
    %3 = vector.broadcast %c16_i32_0 : i32 to vector<4x256xi32>
    %4 = arith.subi %0, %3 : vector<4x256xi32>
    %5 = arith.select %2, %4, %0 : vector<4x256xi1>, vector<4x256xi32>
    %c32_i32 = arith.constant 32 : i32
    %6 = vector.broadcast %c32_i32 : i32 to vector<4x256xi32>
    %7 = arith.cmpi sge, %0, %6 : vector<4x256xi32>
    %c32_i32_1 = arith.constant 32 : i32
    %8 = vector.broadcast %c32_i32_1 : i32 to vector<4x256xi32>
    %9 = arith.subi %0, %8 : vector<4x256xi32>
    %10 = arith.select %7, %9, %5 : vector<4x256xi1>, vector<4x256xi32>
    %c48_i32 = arith.constant 48 : i32
    %11 = vector.broadcast %c48_i32 : i32 to vector<4x256xi32>
    %12 = arith.cmpi sge, %0, %11 : vector<4x256xi32>
    %c48_i32_2 = arith.constant 48 : i32
    %13 = vector.broadcast %c48_i32_2 : i32 to vector<4x256xi32>
    %14 = arith.subi %0, %13 : vector<4x256xi32>
    %15 = arith.select %12, %14, %10 : vector<4x256xi1>, vector<4x256xi32>
    %c64_i32 = arith.constant 64 : i32
    %16 = vector.broadcast %c64_i32 : i32 to vector<4x256xi32>
    %17 = arith.cmpi sge, %0, %16 : vector<4x256xi32>
    %c64_i32_3 = arith.constant 64 : i32
    %18 = vector.broadcast %c64_i32_3 : i32 to vector<4x256xi32>
    %19 = arith.subi %0, %18 : vector<4x256xi32>
    %20 = arith.select %17, %19, %15 : vector<4x256xi1>, vector<4x256xi32>
    %c80_i32 = arith.constant 80 : i32
    %21 = vector.broadcast %c80_i32 : i32 to vector<4x256xi32>
    %22 = arith.cmpi sge, %0, %21 : vector<4x256xi32>
    %c80_i32_4 = arith.constant 80 : i32
    %23 = vector.broadcast %c80_i32_4 : i32 to vector<4x256xi32>
    %24 = arith.subi %0, %23 : vector<4x256xi32>
    %25 = arith.select %22, %24, %20 : vector<4x256xi1>, vector<4x256xi32>
    %c96_i32 = arith.constant 96 : i32
    %26 = vector.broadcast %c96_i32 : i32 to vector<4x256xi32>
    %27 = arith.cmpi sge, %0, %26 : vector<4x256xi32>
    %c96_i32_5 = arith.constant 96 : i32
    %28 = vector.broadcast %c96_i32_5 : i32 to vector<4x256xi32>
    %29 = arith.subi %0, %28 : vector<4x256xi32>
    %30 = arith.select %27, %29, %25 : vector<4x256xi1>, vector<4x256xi32>
    %c112_i32 = arith.constant 112 : i32
    %31 = vector.broadcast %c112_i32 : i32 to vector<4x256xi32>
    %32 = arith.cmpi sge, %0, %31 : vector<4x256xi32>
    %c112_i32_6 = arith.constant 112 : i32
    %33 = vector.broadcast %c112_i32_6 : i32 to vector<4x256xi32>
    %34 = arith.subi %0, %33 : vector<4x256xi32>
    %35 = arith.select %32, %34, %30 : vector<4x256xi1>, vector<4x256xi32>
    %c128_i32 = arith.constant 128 : i32
    %36 = vector.broadcast %c128_i32 : i32 to vector<4x256xi32>
    %37 = arith.cmpi sge, %0, %36 : vector<4x256xi32>
    %c128_i32_7 = arith.constant 128 : i32
    %38 = vector.broadcast %c128_i32_7 : i32 to vector<4x256xi32>
    %39 = arith.subi %0, %38 : vector<4x256xi32>
    %40 = arith.select %37, %39, %35 : vector<4x256xi1>, vector<4x256xi32>
    %c144_i32 = arith.constant 144 : i32
    %41 = vector.broadcast %c144_i32 : i32 to vector<4x256xi32>
    %42 = arith.cmpi sge, %0, %41 : vector<4x256xi32>
    %c144_i32_8 = arith.constant 144 : i32
    %43 = vector.broadcast %c144_i32_8 : i32 to vector<4x256xi32>
    %44 = arith.subi %0, %43 : vector<4x256xi32>
    %45 = arith.select %42, %44, %40 : vector<4x256xi1>, vector<4x256xi32>
    %c160_i32 = arith.constant 160 : i32
    %46 = vector.broadcast %c160_i32 : i32 to vector<4x256xi32>
    %47 = arith.cmpi sge, %0, %46 : vector<4x256xi32>
    %c160_i32_9 = arith.constant 160 : i32
    %48 = vector.broadcast %c160_i32_9 : i32 to vector<4x256xi32>
    %49 = arith.subi %0, %48 : vector<4x256xi32>
    %50 = arith.select %47, %49, %45 : vector<4x256xi1>, vector<4x256xi32>
    %c176_i32 = arith.constant 176 : i32
    %51 = vector.broadcast %c176_i32 : i32 to vector<4x256xi32>
    %52 = arith.cmpi sge, %0, %51 : vector<4x256xi32>
    %c176_i32_10 = arith.constant 176 : i32
    %53 = vector.broadcast %c176_i32_10 : i32 to vector<4x256xi32>
    %54 = arith.subi %0, %53 : vector<4x256xi32>
    %55 = arith.select %52, %54, %50 : vector<4x256xi1>, vector<4x256xi32>
    %c192_i32 = arith.constant 192 : i32
    %56 = vector.broadcast %c192_i32 : i32 to vector<4x256xi32>
    %57 = arith.cmpi sge, %0, %56 : vector<4x256xi32>
    %c192_i32_11 = arith.constant 192 : i32
    %58 = vector.broadcast %c192_i32_11 : i32 to vector<4x256xi32>
    %59 = arith.subi %0, %58 : vector<4x256xi32>
    %60 = arith.select %57, %59, %55 : vector<4x256xi1>, vector<4x256xi32>
    %c208_i32 = arith.constant 208 : i32
    %61 = vector.broadcast %c208_i32 : i32 to vector<4x256xi32>
    %62 = arith.cmpi sge, %0, %61 : vector<4x256xi32>
    %c208_i32_12 = arith.constant 208 : i32
    %63 = vector.broadcast %c208_i32_12 : i32 to vector<4x256xi32>
    %64 = arith.subi %0, %63 : vector<4x256xi32>
    %65 = arith.select %62, %64, %60 : vector<4x256xi1>, vector<4x256xi32>
    %c224_i32 = arith.constant 224 : i32
    %66 = vector.broadcast %c224_i32 : i32 to vector<4x256xi32>
    %67 = arith.cmpi sge, %0, %66 : vector<4x256xi32>
    %c224_i32_13 = arith.constant 224 : i32
    %68 = vector.broadcast %c224_i32_13 : i32 to vector<4x256xi32>
    %69 = arith.subi %0, %68 : vector<4x256xi32>
    %70 = arith.select %67, %69, %65 : vector<4x256xi1>, vector<4x256xi32>
    %c240_i32 = arith.constant 240 : i32
    %71 = vector.broadcast %c240_i32 : i32 to vector<4x256xi32>
    %72 = arith.cmpi sge, %0, %71 : vector<4x256xi32>
    %c240_i32_14 = arith.constant 240 : i32
    %73 = vector.broadcast %c240_i32_14 : i32 to vector<4x256xi32>
    %74 = arith.subi %0, %73 : vector<4x256xi32>
    %75 = arith.select %72, %74, %70 : vector<4x256xi1>, vector<4x256xi32>
    %c0_i32 = arith.constant 0 : i32
    %76 = vector.broadcast %c0_i32 : i32 to vector<4x256xi32>
    %77 = arith.cmpi eq, %75, %76 : vector<4x256xi32>
    %c15_i32 = arith.constant 15 : i32
    %78 = vector.broadcast %c15_i32 : i32 to vector<4x256xi32>
    %79 = arith.cmpi eq, %75, %78 : vector<4x256xi32>
    %c0 = arith.constant 0 : index
    %c0_15 = arith.constant 0 : index
    %c0_16 = arith.constant 0 : index
    %80 = vector.load %arg1[%c0, %c0_15, %c0_16] : memref<1x4x256xf32, #tpu.memory_space<vmem>>, vector<1x4x256xf32>
    %81 = vector.shape_cast %80 : vector<1x4x256xf32> to vector<4x256xf32>
    %82 = vector.extract_strided_slice %81 {offsets = [0, 16], sizes = [4, 16], strides = [1, 1]} : vector<4x256xf32> to vector<4x16xf32>
    %83 = vector.extract_strided_slice %81 {offsets = [0, 0], sizes = [4, 240], strides = [1, 1]} : vector<4x256xf32> to vector<4x240xf32>
    %84 = tpu.concatenate %82, %83 in 1 : vector<4x16xf32>, vector<4x240xf32> -> vector<4x256xf32>
    %85 = vector.extract_strided_slice %84 {offsets = [0, 0], sizes = [4, 1], strides = [1, 1]} : vector<4x256xf32> to vector<4x1xf32>
    %86 = vector.extract_strided_slice %84 {offsets = [0, 0], sizes = [4, 255], strides = [1, 1]} : vector<4x256xf32> to vector<4x255xf32>
    %87 = tpu.concatenate %85, %86 in 1 : vector<4x1xf32>, vector<4x255xf32> -> vector<4x256xf32>
    %88 = vector.extract_strided_slice %84 {offsets = [0, 1], sizes = [4, 255], strides = [1, 1]} : vector<4x256xf32> to vector<4x255xf32>
    %89 = vector.extract_strided_slice %84 {offsets = [0, 255], sizes = [4, 1], strides = [1, 1]} : vector<4x256xf32> to vector<4x1xf32>
    %90 = tpu.concatenate %88, %89 in 1 : vector<4x255xf32>, vector<4x1xf32> -> vector<4x256xf32>
    %91 = arith.select %77, %90, %87 : vector<4x256xi1>, vector<4x256xf32>
    %c0_17 = arith.constant 0 : index
    %c0_18 = arith.constant 0 : index
    %c0_19 = arith.constant 0 : index
    %92 = vector.load %arg2[%c0_17, %c0_18, %c0_19] : memref<9x4x4xbf16, #tpu.memory_space<vmem>>, vector<1x4x4xbf16>
    %93 = vector.shape_cast %92 : vector<1x4x4xbf16> to vector<4x4xbf16>
    %94 = arith.truncf %91 : vector<4x256xf32> to vector<4x256xbf16>
    %cst = arith.constant dense<0.000000e+00> : vector<4x256xf32>
    %95 = tpu.matmul %93, %94, %cst {dimension_numbers = #tpu.dot_dimension_numbers<[1], [0], [0], [1], [0, 0, 1, 1], [], []>} : vector<4x4xbf16>, vector<4x256xbf16>, vector<4x256xf32> -> vector<4x256xf32>
    %c1 = arith.constant 1 : index
    %c0_20 = arith.constant 0 : index
    %c0_21 = arith.constant 0 : index
    %96 = vector.load %arg2[%c1, %c0_20, %c0_21] : memref<9x4x4xbf16, #tpu.memory_space<vmem>>, vector<1x4x4xbf16>
    %97 = vector.shape_cast %96 : vector<1x4x4xbf16> to vector<4x4xbf16>
    %98 = arith.truncf %84 : vector<4x256xf32> to vector<4x256xbf16>
    %cst_22 = arith.constant dense<0.000000e+00> : vector<4x256xf32>
    %99 = tpu.matmul %97, %98, %cst_22 {dimension_numbers = #tpu.dot_dimension_numbers<[1], [0], [0], [1], [0, 0, 1, 1], [], []>} : vector<4x4xbf16>, vector<4x256xbf16>, vector<4x256xf32> -> vector<4x256xf32>
    %100 = arith.addf %95, %99 : vector<4x256xf32>
    %101 = vector.extract_strided_slice %84 {offsets = [0, 0], sizes = [4, 1], strides = [1, 1]} : vector<4x256xf32> to vector<4x1xf32>
    %102 = vector.extract_strided_slice %84 {offsets = [0, 0], sizes = [4, 255], strides = [1, 1]} : vector<4x256xf32> to vector<4x255xf32>
    %103 = tpu.concatenate %101, %102 in 1 : vector<4x1xf32>, vector<4x255xf32> -> vector<4x256xf32>
    %104 = vector.extract_strided_slice %84 {offsets = [0, 1], sizes = [4, 255], strides = [1, 1]} : vector<4x256xf32> to vector<4x255xf32>
    %105 = vector.extract_strided_slice %84 {offsets = [0, 255], sizes = [4, 1], strides = [1, 1]} : vector<4x256xf32> to vector<4x1xf32>
    %106 = tpu.concatenate %104, %105 in 1 : vector<4x255xf32>, vector<4x1xf32> -> vector<4x256xf32>
    %107 = arith.select %79, %103, %106 : vector<4x256xi1>, vector<4x256xf32>
    %c2 = arith.constant 2 : index
    %c0_23 = arith.constant 0 : index
    %c0_24 = arith.constant 0 : index
    %108 = vector.load %arg2[%c2, %c0_23, %c0_24] : memref<9x4x4xbf16, #tpu.memory_space<vmem>>, vector<1x4x4xbf16>
    %109 = vector.shape_cast %108 : vector<1x4x4xbf16> to vector<4x4xbf16>
    %110 = arith.truncf %107 : vector<4x256xf32> to vector<4x256xbf16>
    %cst_25 = arith.constant dense<0.000000e+00> : vector<4x256xf32>
    %111 = tpu.matmul %109, %110, %cst_25 {dimension_numbers = #tpu.dot_dimension_numbers<[1], [0], [0], [1], [0, 0, 1, 1], [], []>} : vector<4x4xbf16>, vector<4x256xbf16>, vector<4x256xf32> -> vector<4x256xf32>
    %112 = arith.addf %100, %111 : vector<4x256xf32>
    %113 = vector.extract_strided_slice %81 {offsets = [0, 0], sizes = [4, 1], strides = [1, 1]} : vector<4x256xf32> to vector<4x1xf32>
    %114 = vector.extract_strided_slice %81 {offsets = [0, 0], sizes = [4, 255], strides = [1, 1]} : vector<4x256xf32> to vector<4x255xf32>
    %115 = tpu.concatenate %113, %114 in 1 : vector<4x1xf32>, vector<4x255xf32> -> vector<4x256xf32>
    %116 = vector.extract_strided_slice %81 {offsets = [0, 1], sizes = [4, 255], strides = [1, 1]} : vector<4x256xf32> to vector<4x255xf32>
    %117 = vector.extract_strided_slice %81 {offsets = [0, 255], sizes = [4, 1], strides = [1, 1]} : vector<4x256xf32> to vector<4x1xf32>
    %118 = tpu.concatenate %116, %117 in 1 : vector<4x255xf32>, vector<4x1xf32> -> vector<4x256xf32>
    %119 = arith.select %77, %118, %115 : vector<4x256xi1>, vector<4x256xf32>
    %c3 = arith.constant 3 : index
    %c0_26 = arith.constant 0 : index
    %c0_27 = arith.constant 0 : index
    %120 = vector.load %arg2[%c3, %c0_26, %c0_27] : memref<9x4x4xbf16, #tpu.memory_space<vmem>>, vector<1x4x4xbf16>
    %121 = vector.shape_cast %120 : vector<1x4x4xbf16> to vector<4x4xbf16>
    %122 = arith.truncf %119 : vector<4x256xf32> to vector<4x256xbf16>
    %cst_28 = arith.constant dense<0.000000e+00> : vector<4x256xf32>
    %123 = tpu.matmul %121, %122, %cst_28 {dimension_numbers = #tpu.dot_dimension_numbers<[1], [0], [0], [1], [0, 0, 1, 1], [], []>} : vector<4x4xbf16>, vector<4x256xbf16>, vector<4x256xf32> -> vector<4x256xf32>
    %124 = arith.addf %112, %123 : vector<4x256xf32>
    %c4 = arith.constant 4 : index
    %c0_29 = arith.constant 0 : index
    %c0_30 = arith.constant 0 : index
    %125 = vector.load %arg2[%c4, %c0_29, %c0_30] : memref<9x4x4xbf16, #tpu.memory_space<vmem>>, vector<1x4x4xbf16>
    %126 = vector.shape_cast %125 : vector<1x4x4xbf16> to vector<4x4xbf16>
    %127 = arith.truncf %81 : vector<4x256xf32> to vector<4x256xbf16>
    %cst_31 = arith.constant dense<0.000000e+00> : vector<4x256xf32>
    %128 = tpu.matmul %126, %127, %cst_31 {dimension_numbers = #tpu.dot_dimension_numbers<[1], [0], [0], [1], [0, 0, 1, 1], [], []>} : vector<4x4xbf16>, vector<4x256xbf16>, vector<4x256xf32> -> vector<4x256xf32>
    %129 = arith.addf %124, %128 : vector<4x256xf32>
    %130 = vector.extract_strided_slice %81 {offsets = [0, 0], sizes = [4, 1], strides = [1, 1]} : vector<4x256xf32> to vector<4x1xf32>
    %131 = vector.extract_strided_slice %81 {offsets = [0, 0], sizes = [4, 255], strides = [1, 1]} : vector<4x256xf32> to vector<4x255xf32>
    %132 = tpu.concatenate %130, %131 in 1 : vector<4x1xf32>, vector<4x255xf32> -> vector<4x256xf32>
    %133 = vector.extract_strided_slice %81 {offsets = [0, 1], sizes = [4, 255], strides = [1, 1]} : vector<4x256xf32> to vector<4x255xf32>
    %134 = vector.extract_strided_slice %81 {offsets = [0, 255], sizes = [4, 1], strides = [1, 1]} : vector<4x256xf32> to vector<4x1xf32>
    %135 = tpu.concatenate %133, %134 in 1 : vector<4x255xf32>, vector<4x1xf32> -> vector<4x256xf32>
    %136 = arith.select %79, %132, %135 : vector<4x256xi1>, vector<4x256xf32>
    %c5 = arith.constant 5 : index
    %c0_32 = arith.constant 0 : index
    %c0_33 = arith.constant 0 : index
    %137 = vector.load %arg2[%c5, %c0_32, %c0_33] : memref<9x4x4xbf16, #tpu.memory_space<vmem>>, vector<1x4x4xbf16>
    %138 = vector.shape_cast %137 : vector<1x4x4xbf16> to vector<4x4xbf16>
    %139 = arith.truncf %136 : vector<4x256xf32> to vector<4x256xbf16>
    %cst_34 = arith.constant dense<0.000000e+00> : vector<4x256xf32>
    %140 = tpu.matmul %138, %139, %cst_34 {dimension_numbers = #tpu.dot_dimension_numbers<[1], [0], [0], [1], [0, 0, 1, 1], [], []>} : vector<4x4xbf16>, vector<4x256xbf16>, vector<4x256xf32> -> vector<4x256xf32>
    %141 = arith.addf %129, %140 : vector<4x256xf32>
    %142 = vector.extract_strided_slice %81 {offsets = [0, 16], sizes = [4, 240], strides = [1, 1]} : vector<4x256xf32> to vector<4x240xf32>
    %143 = vector.extract_strided_slice %81 {offsets = [0, 224], sizes = [4, 16], strides = [1, 1]} : vector<4x256xf32> to vector<4x16xf32>
    %144 = tpu.concatenate %142, %143 in 1 : vector<4x240xf32>, vector<4x16xf32> -> vector<4x256xf32>
    %145 = vector.extract_strided_slice %144 {offsets = [0, 0], sizes = [4, 1], strides = [1, 1]} : vector<4x256xf32> to vector<4x1xf32>
    %146 = vector.extract_strided_slice %144 {offsets = [0, 0], sizes = [4, 255], strides = [1, 1]} : vector<4x256xf32> to vector<4x255xf32>
    %147 = tpu.concatenate %145, %146 in 1 : vector<4x1xf32>, vector<4x255xf32> -> vector<4x256xf32>
    %148 = vector.extract_strided_slice %144 {offsets = [0, 1], sizes = [4, 255], strides = [1, 1]} : vector<4x256xf32> to vector<4x255xf32>
    %149 = vector.extract_strided_slice %144 {offsets = [0, 255], sizes = [4, 1], strides = [1, 1]} : vector<4x256xf32> to vector<4x1xf32>
    %150 = tpu.concatenate %148, %149 in 1 : vector<4x255xf32>, vector<4x1xf32> -> vector<4x256xf32>
    %151 = arith.select %77, %150, %147 : vector<4x256xi1>, vector<4x256xf32>
    %c6 = arith.constant 6 : index
    %c0_35 = arith.constant 0 : index
    %c0_36 = arith.constant 0 : index
    %152 = vector.load %arg2[%c6, %c0_35, %c0_36] : memref<9x4x4xbf16, #tpu.memory_space<vmem>>, vector<1x4x4xbf16>
    %153 = vector.shape_cast %152 : vector<1x4x4xbf16> to vector<4x4xbf16>
    %154 = arith.truncf %151 : vector<4x256xf32> to vector<4x256xbf16>
    %cst_37 = arith.constant dense<0.000000e+00> : vector<4x256xf32>
    %155 = tpu.matmul %153, %154, %cst_37 {dimension_numbers = #tpu.dot_dimension_numbers<[1], [0], [0], [1], [0, 0, 1, 1], [], []>} : vector<4x4xbf16>, vector<4x256xbf16>, vector<4x256xf32> -> vector<4x256xf32>
    %156 = arith.addf %141, %155 : vector<4x256xf32>
    %c7 = arith.constant 7 : index
    %c0_38 = arith.constant 0 : index
    %c0_39 = arith.constant 0 : index
    %157 = vector.load %arg2[%c7, %c0_38, %c0_39] : memref<9x4x4xbf16, #tpu.memory_space<vmem>>, vector<1x4x4xbf16>
    %158 = vector.shape_cast %157 : vector<1x4x4xbf16> to vector<4x4xbf16>
    %159 = arith.truncf %144 : vector<4x256xf32> to vector<4x256xbf16>
    %cst_40 = arith.constant dense<0.000000e+00> : vector<4x256xf32>
    %160 = tpu.matmul %158, %159, %cst_40 {dimension_numbers = #tpu.dot_dimension_numbers<[1], [0], [0], [1], [0, 0, 1, 1], [], []>} : vector<4x4xbf16>, vector<4x256xbf16>, vector<4x256xf32> -> vector<4x256xf32>
    %161 = arith.addf %156, %160 : vector<4x256xf32>
    %162 = vector.extract_strided_slice %144 {offsets = [0, 0], sizes = [4, 1], strides = [1, 1]} : vector<4x256xf32> to vector<4x1xf32>
    %163 = vector.extract_strided_slice %144 {offsets = [0, 0], sizes = [4, 255], strides = [1, 1]} : vector<4x256xf32> to vector<4x255xf32>
    %164 = tpu.concatenate %162, %163 in 1 : vector<4x1xf32>, vector<4x255xf32> -> vector<4x256xf32>
    %165 = vector.extract_strided_slice %144 {offsets = [0, 1], sizes = [4, 255], strides = [1, 1]} : vector<4x256xf32> to vector<4x255xf32>
    %166 = vector.extract_strided_slice %144 {offsets = [0, 255], sizes = [4, 1], strides = [1, 1]} : vector<4x256xf32> to vector<4x1xf32>
    %167 = tpu.concatenate %165, %166 in 1 : vector<4x255xf32>, vector<4x1xf32> -> vector<4x256xf32>
    %168 = arith.select %79, %164, %167 : vector<4x256xi1>, vector<4x256xf32>
    %c8 = arith.constant 8 : index
    %c0_41 = arith.constant 0 : index
    %c0_42 = arith.constant 0 : index
    %169 = vector.load %arg2[%c8, %c0_41, %c0_42] : memref<9x4x4xbf16, #tpu.memory_space<vmem>>, vector<1x4x4xbf16>
    %170 = vector.shape_cast %169 : vector<1x4x4xbf16> to vector<4x4xbf16>
    %171 = arith.truncf %168 : vector<4x256xf32> to vector<4x256xbf16>
    %cst_43 = arith.constant dense<0.000000e+00> : vector<4x256xf32>
    %172 = tpu.matmul %170, %171, %cst_43 {dimension_numbers = #tpu.dot_dimension_numbers<[1], [0], [0], [1], [0, 0, 1, 1], [], []>} : vector<4x4xbf16>, vector<4x256xbf16>, vector<4x256xf32> -> vector<4x256xf32>
    %173 = arith.addf %161, %172 : vector<4x256xf32>
    %c0_44 = arith.constant 0 : index
    %c0_45 = arith.constant 0 : index
    %174 = vector.load %arg3[%c0_44, %c0_45] : memref<4x1xf32, #tpu.memory_space<vmem>>, vector<4x1xf32>
    %175 = vector.broadcast %174 : vector<4x1xf32> to vector<4x256xf32>
    %176 = arith.addf %173, %175 : vector<4x256xf32>
    %cst_46 = arith.constant dense<0.000000e+00> : vector<4xf32>
    %177 = vector.multi_reduction <add>, %176, %cst_46 [1] : vector<4x256xf32> to vector<4xf32>
    %178 = vector.shape_cast %177 : vector<4xf32> to vector<4x1xf32>
    %cst_47 = arith.constant 2.560000e+02 : f32
    %179 = vector.broadcast %cst_47 : f32 to vector<4x1xf32>
    %180 = arith.divf %178, %179 : vector<4x1xf32>
    %181 = vector.broadcast %180 : vector<4x1xf32> to vector<4x256xf32>
    %182 = arith.subf %176, %181 : vector<4x256xf32>
    %183 = arith.mulf %182, %182 : vector<4x256xf32>
    %cst_48 = arith.constant dense<0.000000e+00> : vector<4xf32>
    %184 = vector.multi_reduction <add>, %183, %cst_48 [1] : vector<4x256xf32> to vector<4xf32>
    %185 = vector.shape_cast %184 : vector<4xf32> to vector<4x1xf32>
    %cst_49 = arith.constant 2.560000e+02 : f32
    %186 = vector.broadcast %cst_49 : f32 to vector<4x1xf32>
    %187 = arith.divf %185, %186 : vector<4x1xf32>
    %cst_50 = arith.constant 9.99999974E-6 : f32
    %188 = vector.broadcast %cst_50 : f32 to vector<4x1xf32>
    %189 = arith.addf %187, %188 : vector<4x1xf32>
    %190 = math.rsqrt %189 : vector<4x1xf32>
    %191 = vector.broadcast %190 : vector<4x1xf32> to vector<4x256xf32>
    %192 = arith.mulf %182, %191 : vector<4x256xf32>
    %cst_51 = arith.constant 0.000000e+00 : f32
    %193 = vector.broadcast %cst_51 : f32 to vector<4x256xf32>
    %194 = arith.maximumf %192, %193 : vector<4x256xf32>
    %195 = vector.extract_strided_slice %194 {offsets = [0, 16], sizes = [4, 16], strides = [1, 1]} : vector<4x256xf32> to vector<4x16xf32>
    %196 = vector.extract_strided_slice %194 {offsets = [0, 0], sizes = [4, 240], strides = [1, 1]} : vector<4x256xf32> to vector<4x240xf32>
    %197 = tpu.concatenate %195, %196 in 1 : vector<4x16xf32>, vector<4x240xf32> -> vector<4x256xf32>
    %198 = vector.extract_strided_slice %197 {offsets = [0, 0], sizes = [4, 1], strides = [1, 1]} : vector<4x256xf32> to vector<4x1xf32>
    %199 = vector.extract_strided_slice %197 {offsets = [0, 0], sizes = [4, 255], strides = [1, 1]} : vector<4x256xf32> to vector<4x255xf32>
    %200 = tpu.concatenate %198, %199 in 1 : vector<4x1xf32>, vector<4x255xf32> -> vector<4x256xf32>
    %201 = vector.extract_strided_slice %197 {offsets = [0, 1], sizes = [4, 255], strides = [1, 1]} : vector<4x256xf32> to vector<4x255xf32>
    %202 = vector.extract_strided_slice %197 {offsets = [0, 255], sizes = [4, 1], strides = [1, 1]} : vector<4x256xf32> to vector<4x1xf32>
    %203 = tpu.concatenate %201, %202 in 1 : vector<4x255xf32>, vector<4x1xf32> -> vector<4x256xf32>
    %204 = arith.select %77, %203, %200 : vector<4x256xi1>, vector<4x256xf32>
    %c0_52 = arith.constant 0 : index
    %c0_53 = arith.constant 0 : index
    %c0_54 = arith.constant 0 : index
    %205 = vector.load %arg4[%c0_52, %c0_53, %c0_54] : memref<9x4x4xbf16, #tpu.memory_space<vmem>>, vector<1x4x4xbf16>
    %206 = vector.shape_cast %205 : vector<1x4x4xbf16> to vector<4x4xbf16>
    %207 = arith.truncf %204 : vector<4x256xf32> to vector<4x256xbf16>
    %cst_55 = arith.constant dense<0.000000e+00> : vector<4x256xf32>
    %208 = tpu.matmul %206, %207, %cst_55 {dimension_numbers = #tpu.dot_dimension_numbers<[1], [0], [0], [1], [0, 0, 1, 1], [], []>} : vector<4x4xbf16>, vector<4x256xbf16>, vector<4x256xf32> -> vector<4x256xf32>
    %c1_56 = arith.constant 1 : index
    %c0_57 = arith.constant 0 : index
    %c0_58 = arith.constant 0 : index
    %209 = vector.load %arg4[%c1_56, %c0_57, %c0_58] : memref<9x4x4xbf16, #tpu.memory_space<vmem>>, vector<1x4x4xbf16>
    %210 = vector.shape_cast %209 : vector<1x4x4xbf16> to vector<4x4xbf16>
    %211 = arith.truncf %197 : vector<4x256xf32> to vector<4x256xbf16>
    %cst_59 = arith.constant dense<0.000000e+00> : vector<4x256xf32>
    %212 = tpu.matmul %210, %211, %cst_59 {dimension_numbers = #tpu.dot_dimension_numbers<[1], [0], [0], [1], [0, 0, 1, 1], [], []>} : vector<4x4xbf16>, vector<4x256xbf16>, vector<4x256xf32> -> vector<4x256xf32>
    %213 = arith.addf %208, %212 : vector<4x256xf32>
    %214 = vector.extract_strided_slice %197 {offsets = [0, 0], sizes = [4, 1], strides = [1, 1]} : vector<4x256xf32> to vector<4x1xf32>
    %215 = vector.extract_strided_slice %197 {offsets = [0, 0], sizes = [4, 255], strides = [1, 1]} : vector<4x256xf32> to vector<4x255xf32>
    %216 = tpu.concatenate %214, %215 in 1 : vector<4x1xf32>, vector<4x255xf32> -> vector<4x256xf32>
    %217 = vector.extract_strided_slice %197 {offsets = [0, 1], sizes = [4, 255], strides = [1, 1]} : vector<4x256xf32> to vector<4x255xf32>
    %218 = vector.extract_strided_slice %197 {offsets = [0, 255], sizes = [4, 1], strides = [1, 1]} : vector<4x256xf32> to vector<4x1xf32>
    %219 = tpu.concatenate %217, %218 in 1 : vector<4x255xf32>, vector<4x1xf32> -> vector<4x256xf32>
    %220 = arith.select %79, %216, %219 : vector<4x256xi1>, vector<4x256xf32>
    %c2_60 = arith.constant 2 : index
    %c0_61 = arith.constant 0 : index
    %c0_62 = arith.constant 0 : index
    %221 = vector.load %arg4[%c2_60, %c0_61, %c0_62] : memref<9x4x4xbf16, #tpu.memory_space<vmem>>, vector<1x4x4xbf16>
    %222 = vector.shape_cast %221 : vector<1x4x4xbf16> to vector<4x4xbf16>
    %223 = arith.truncf %220 : vector<4x256xf32> to vector<4x256xbf16>
    %cst_63 = arith.constant dense<0.000000e+00> : vector<4x256xf32>
    %224 = tpu.matmul %222, %223, %cst_63 {dimension_numbers = #tpu.dot_dimension_numbers<[1], [0], [0], [1], [0, 0, 1, 1], [], []>} : vector<4x4xbf16>, vector<4x256xbf16>, vector<4x256xf32> -> vector<4x256xf32>
    %225 = arith.addf %213, %224 : vector<4x256xf32>
    %226 = vector.extract_strided_slice %194 {offsets = [0, 0], sizes = [4, 1], strides = [1, 1]} : vector<4x256xf32> to vector<4x1xf32>
    %227 = vector.extract_strided_slice %194 {offsets = [0, 0], sizes = [4, 255], strides = [1, 1]} : vector<4x256xf32> to vector<4x255xf32>
    %228 = tpu.concatenate %226, %227 in 1 : vector<4x1xf32>, vector<4x255xf32> -> vector<4x256xf32>
    %229 = vector.extract_strided_slice %194 {offsets = [0, 1], sizes = [4, 255], strides = [1, 1]} : vector<4x256xf32> to vector<4x255xf32>
    %230 = vector.extract_strided_slice %194 {offsets = [0, 255], sizes = [4, 1], strides = [1, 1]} : vector<4x256xf32> to vector<4x1xf32>
    %231 = tpu.concatenate %229, %230 in 1 : vector<4x255xf32>, vector<4x1xf32> -> vector<4x256xf32>
    %232 = arith.select %77, %231, %228 : vector<4x256xi1>, vector<4x256xf32>
    %c3_64 = arith.constant 3 : index
    %c0_65 = arith.constant 0 : index
    %c0_66 = arith.constant 0 : index
    %233 = vector.load %arg4[%c3_64, %c0_65, %c0_66] : memref<9x4x4xbf16, #tpu.memory_space<vmem>>, vector<1x4x4xbf16>
    %234 = vector.shape_cast %233 : vector<1x4x4xbf16> to vector<4x4xbf16>
    %235 = arith.truncf %232 : vector<4x256xf32> to vector<4x256xbf16>
    %cst_67 = arith.constant dense<0.000000e+00> : vector<4x256xf32>
    %236 = tpu.matmul %234, %235, %cst_67 {dimension_numbers = #tpu.dot_dimension_numbers<[1], [0], [0], [1], [0, 0, 1, 1], [], []>} : vector<4x4xbf16>, vector<4x256xbf16>, vector<4x256xf32> -> vector<4x256xf32>
    %237 = arith.addf %225, %236 : vector<4x256xf32>
    %c4_68 = arith.constant 4 : index
    %c0_69 = arith.constant 0 : index
    %c0_70 = arith.constant 0 : index
    %238 = vector.load %arg4[%c4_68, %c0_69, %c0_70] : memref<9x4x4xbf16, #tpu.memory_space<vmem>>, vector<1x4x4xbf16>
    %239 = vector.shape_cast %238 : vector<1x4x4xbf16> to vector<4x4xbf16>
    %240 = arith.truncf %194 : vector<4x256xf32> to vector<4x256xbf16>
    %cst_71 = arith.constant dense<0.000000e+00> : vector<4x256xf32>
    %241 = tpu.matmul %239, %240, %cst_71 {dimension_numbers = #tpu.dot_dimension_numbers<[1], [0], [0], [1], [0, 0, 1, 1], [], []>} : vector<4x4xbf16>, vector<4x256xbf16>, vector<4x256xf32> -> vector<4x256xf32>
    %242 = arith.addf %237, %241 : vector<4x256xf32>
    %243 = vector.extract_strided_slice %194 {offsets = [0, 0], sizes = [4, 1], strides = [1, 1]} : vector<4x256xf32> to vector<4x1xf32>
    %244 = vector.extract_strided_slice %194 {offsets = [0, 0], sizes = [4, 255], strides = [1, 1]} : vector<4x256xf32> to vector<4x255xf32>
    %245 = tpu.concatenate %243, %244 in 1 : vector<4x1xf32>, vector<4x255xf32> -> vector<4x256xf32>
    %246 = vector.extract_strided_slice %194 {offsets = [0, 1], sizes = [4, 255], strides = [1, 1]} : vector<4x256xf32> to vector<4x255xf32>
    %247 = vector.extract_strided_slice %194 {offsets = [0, 255], sizes = [4, 1], strides = [1, 1]} : vector<4x256xf32> to vector<4x1xf32>
    %248 = tpu.concatenate %246, %247 in 1 : vector<4x255xf32>, vector<4x1xf32> -> vector<4x256xf32>
    %249 = arith.select %79, %245, %248 : vector<4x256xi1>, vector<4x256xf32>
    %c5_72 = arith.constant 5 : index
    %c0_73 = arith.constant 0 : index
    %c0_74 = arith.constant 0 : index
    %250 = vector.load %arg4[%c5_72, %c0_73, %c0_74] : memref<9x4x4xbf16, #tpu.memory_space<vmem>>, vector<1x4x4xbf16>
    %251 = vector.shape_cast %250 : vector<1x4x4xbf16> to vector<4x4xbf16>
    %252 = arith.truncf %249 : vector<4x256xf32> to vector<4x256xbf16>
    %cst_75 = arith.constant dense<0.000000e+00> : vector<4x256xf32>
    %253 = tpu.matmul %251, %252, %cst_75 {dimension_numbers = #tpu.dot_dimension_numbers<[1], [0], [0], [1], [0, 0, 1, 1], [], []>} : vector<4x4xbf16>, vector<4x256xbf16>, vector<4x256xf32> -> vector<4x256xf32>
    %254 = arith.addf %242, %253 : vector<4x256xf32>
    %255 = vector.extract_strided_slice %194 {offsets = [0, 16], sizes = [4, 240], strides = [1, 1]} : vector<4x256xf32> to vector<4x240xf32>
    %256 = vector.extract_strided_slice %194 {offsets = [0, 224], sizes = [4, 16], strides = [1, 1]} : vector<4x256xf32> to vector<4x16xf32>
    %257 = tpu.concatenate %255, %256 in 1 : vector<4x240xf32>, vector<4x16xf32> -> vector<4x256xf32>
    %258 = vector.extract_strided_slice %257 {offsets = [0, 0], sizes = [4, 1], strides = [1, 1]} : vector<4x256xf32> to vector<4x1xf32>
    %259 = vector.extract_strided_slice %257 {offsets = [0, 0], sizes = [4, 255], strides = [1, 1]} : vector<4x256xf32> to vector<4x255xf32>
    %260 = tpu.concatenate %258, %259 in 1 : vector<4x1xf32>, vector<4x255xf32> -> vector<4x256xf32>
    %261 = vector.extract_strided_slice %257 {offsets = [0, 1], sizes = [4, 255], strides = [1, 1]} : vector<4x256xf32> to vector<4x255xf32>
    %262 = vector.extract_strided_slice %257 {offsets = [0, 255], sizes = [4, 1], strides = [1, 1]} : vector<4x256xf32> to vector<4x1xf32>
    %263 = tpu.concatenate %261, %262 in 1 : vector<4x255xf32>, vector<4x1xf32> -> vector<4x256xf32>
    %264 = arith.select %77, %263, %260 : vector<4x256xi1>, vector<4x256xf32>
    %c6_76 = arith.constant 6 : index
    %c0_77 = arith.constant 0 : index
    %c0_78 = arith.constant 0 : index
    %265 = vector.load %arg4[%c6_76, %c0_77, %c0_78] : memref<9x4x4xbf16, #tpu.memory_space<vmem>>, vector<1x4x4xbf16>
    %266 = vector.shape_cast %265 : vector<1x4x4xbf16> to vector<4x4xbf16>
    %267 = arith.truncf %264 : vector<4x256xf32> to vector<4x256xbf16>
    %cst_79 = arith.constant dense<0.000000e+00> : vector<4x256xf32>
    %268 = tpu.matmul %266, %267, %cst_79 {dimension_numbers = #tpu.dot_dimension_numbers<[1], [0], [0], [1], [0, 0, 1, 1], [], []>} : vector<4x4xbf16>, vector<4x256xbf16>, vector<4x256xf32> -> vector<4x256xf32>
    %269 = arith.addf %254, %268 : vector<4x256xf32>
    %c7_80 = arith.constant 7 : index
    %c0_81 = arith.constant 0 : index
    %c0_82 = arith.constant 0 : index
    %270 = vector.load %arg4[%c7_80, %c0_81, %c0_82] : memref<9x4x4xbf16, #tpu.memory_space<vmem>>, vector<1x4x4xbf16>
    %271 = vector.shape_cast %270 : vector<1x4x4xbf16> to vector<4x4xbf16>
    %272 = arith.truncf %257 : vector<4x256xf32> to vector<4x256xbf16>
    %cst_83 = arith.constant dense<0.000000e+00> : vector<4x256xf32>
    %273 = tpu.matmul %271, %272, %cst_83 {dimension_numbers = #tpu.dot_dimension_numbers<[1], [0], [0], [1], [0, 0, 1, 1], [], []>} : vector<4x4xbf16>, vector<4x256xbf16>, vector<4x256xf32> -> vector<4x256xf32>
    %274 = arith.addf %269, %273 : vector<4x256xf32>
    %275 = vector.extract_strided_slice %257 {offsets = [0, 0], sizes = [4, 1], strides = [1, 1]} : vector<4x256xf32> to vector<4x1xf32>
    %276 = vector.extract_strided_slice %257 {offsets = [0, 0], sizes = [4, 255], strides = [1, 1]} : vector<4x256xf32> to vector<4x255xf32>
    %277 = tpu.concatenate %275, %276 in 1 : vector<4x1xf32>, vector<4x255xf32> -> vector<4x256xf32>
    %278 = vector.extract_strided_slice %257 {offsets = [0, 1], sizes = [4, 255], strides = [1, 1]} : vector<4x256xf32> to vector<4x255xf32>
    %279 = vector.extract_strided_slice %257 {offsets = [0, 255], sizes = [4, 1], strides = [1, 1]} : vector<4x256xf32> to vector<4x1xf32>
    %280 = tpu.concatenate %278, %279 in 1 : vector<4x255xf32>, vector<4x1xf32> -> vector<4x256xf32>
    %281 = arith.select %79, %277, %280 : vector<4x256xi1>, vector<4x256xf32>
    %c8_84 = arith.constant 8 : index
    %c0_85 = arith.constant 0 : index
    %c0_86 = arith.constant 0 : index
    %282 = vector.load %arg4[%c8_84, %c0_85, %c0_86] : memref<9x4x4xbf16, #tpu.memory_space<vmem>>, vector<1x4x4xbf16>
    %283 = vector.shape_cast %282 : vector<1x4x4xbf16> to vector<4x4xbf16>
    %284 = arith.truncf %281 : vector<4x256xf32> to vector<4x256xbf16>
    %cst_87 = arith.constant dense<0.000000e+00> : vector<4x256xf32>
    %285 = tpu.matmul %283, %284, %cst_87 {dimension_numbers = #tpu.dot_dimension_numbers<[1], [0], [0], [1], [0, 0, 1, 1], [], []>} : vector<4x4xbf16>, vector<4x256xbf16>, vector<4x256xf32> -> vector<4x256xf32>
    %286 = arith.addf %274, %285 : vector<4x256xf32>
    %c0_88 = arith.constant 0 : index
    %c0_89 = arith.constant 0 : index
    %287 = vector.load %arg5[%c0_88, %c0_89] : memref<4x1xf32, #tpu.memory_space<vmem>>, vector<4x1xf32>
    %288 = vector.broadcast %287 : vector<4x1xf32> to vector<4x256xf32>
    %289 = arith.addf %286, %288 : vector<4x256xf32>
    %cst_90 = arith.constant dense<0.000000e+00> : vector<4xf32>
    %290 = vector.multi_reduction <add>, %289, %cst_90 [1] : vector<4x256xf32> to vector<4xf32>
    %291 = vector.shape_cast %290 : vector<4xf32> to vector<4x1xf32>
    %cst_91 = arith.constant 2.560000e+02 : f32
    %292 = vector.broadcast %cst_91 : f32 to vector<4x1xf32>
    %293 = arith.divf %291, %292 : vector<4x1xf32>
    %294 = vector.broadcast %293 : vector<4x1xf32> to vector<4x256xf32>
    %295 = arith.subf %289, %294 : vector<4x256xf32>
    %296 = arith.mulf %295, %295 : vector<4x256xf32>
    %cst_92 = arith.constant dense<0.000000e+00> : vector<4xf32>
    %297 = vector.multi_reduction <add>, %296, %cst_92 [1] : vector<4x256xf32> to vector<4xf32>
    %298 = vector.shape_cast %297 : vector<4xf32> to vector<4x1xf32>
    %cst_93 = arith.constant 2.560000e+02 : f32
    %299 = vector.broadcast %cst_93 : f32 to vector<4x1xf32>
    %300 = arith.divf %298, %299 : vector<4x1xf32>
    %cst_94 = arith.constant 9.99999974E-6 : f32
    %301 = vector.broadcast %cst_94 : f32 to vector<4x1xf32>
    %302 = arith.addf %300, %301 : vector<4x1xf32>
    %303 = math.rsqrt %302 : vector<4x1xf32>
    %304 = vector.broadcast %303 : vector<4x1xf32> to vector<4x256xf32>
    %305 = arith.mulf %295, %304 : vector<4x256xf32>
    %c0_95 = arith.constant 0 : index
    %c0_96 = arith.constant 0 : index
    %c0_97 = arith.constant 0 : index
    %306 = vector.load %arg1[%c0_95, %c0_96, %c0_97] : memref<1x4x256xf32, #tpu.memory_space<vmem>>, vector<1x4x256xf32>
    %307 = vector.shape_cast %306 : vector<1x4x256xf32> to vector<4x256xf32>
    %308 = arith.addf %307, %305 : vector<4x256xf32>
    %c0_98 = arith.constant 0 : index
    %c0_99 = arith.constant 0 : index
    %c0_100 = arith.constant 0 : index
    %309 = vector.load %arg6[%c0_98, %c0_99, %c0_100] : memref<1x4x256xf32, #tpu.memory_space<vmem>>, vector<1x4x256xf32>
    %310 = vector.shape_cast %309 : vector<1x4x256xf32> to vector<4x256xf32>
    %311 = vector.shape_cast %308 : vector<4x256xf32> to vector<1x4x256xf32>
    tpu.vector_store %arg6[%c0_98, %c0_99, %c0_100], %311 {strides = array<i32>} : memref<1x4x256xf32, #tpu.memory_space<vmem>>, vector<1x4x256xf32>,
    return
  }
  func.func @transform_0(%arg0: i32) -> (i32, i32, i32) {
    %c0_i32 = arith.constant 0 : i32
    %c0_i32_0 = arith.constant 0 : i32
    %c0_i32_1 = arith.constant 0 : i32
    return %arg0, %c0_i32, %c0_i32_0 : i32, i32, i32
  }
  func.func @transform_1(%arg0: i32) -> (i32, i32, i32) {
    %c0_i32 = arith.constant 0 : i32
    %c0_i32_0 = arith.constant 0 : i32
    %c0_i32_1 = arith.constant 0 : i32
    %c0_i32_2 = arith.constant 0 : i32
    return %c0_i32, %c0_i32_0, %c0_i32_1 : i32, i32, i32
  }
  func.func @transform_2(%arg0: i32) -> (i32, i32) {
    %c0_i32 = arith.constant 0 : i32
    %c0_i32_0 = arith.constant 0 : i32
    %c0_i32_1 = arith.constant 0 : i32
    return %c0_i32, %c0_i32_0 : i32, i32
  }
  func.func @transform_3(%arg0: i32) -> (i32, i32, i32) {
    %c0_i32 = arith.constant 0 : i32
    %c0_i32_0 = arith.constant 0 : i32
    %c0_i32_1 = arith.constant 0 : i32
    %c0_i32_2 = arith.constant 0 : i32
    return %c0_i32, %c0_i32_0, %c0_i32_1 : i32, i32, i32
  }
  func.func @transform_4(%arg0: i32) -> (i32, i32) {
    %c0_i32 = arith.constant 0 : i32
    %c0_i32_0 = arith.constant 0 : i32
    %c0_i32_1 = arith.constant 0 : i32
    return %c0_i32, %c0_i32_0 : i32, i32
  }
  func.func @transform_5(%arg0: i32) -> (i32, i32, i32) {
    %c0_i32 = arith.constant 0 : i32
    %c0_i32_0 = arith.constant 0 : i32
    %c0_i32_1 = arith.constant 0 : i32
    return %arg0, %c0_i32, %c0_i32_0 : i32, i32, i32
  }
}

</mosaic_0001>

<bundles_post_ra>
// kernel: resnet_block_pallas.1
= control target key start
LH: loop header
LB: loop body
LE: loop exit
PB: predicated region body
PF: predicated region fallthrough
CT: control target
= control target key end

     0   :  { %s1840_s18 = smov 0   ;;  %s2179_s0 = inlined_call_operand.vmem [shape: f32[2,4,256], index: 0, kind: input, shape index: {}]   ;;  %s2180_s1 = inlined_call_operand.vmem [shape: bf16[9,4,4], index: 1, kind: input, shape index: {}]   ;;  %s2181_s2 = inlined_call_operand.vmem [shape: f32[4,1], index: 2, kind: input, shape index: {}]   ;;  %s2182_s3 = inlined_call_operand.vmem [shape: bf16[9,4,4], index: 3, kind: input, shape index: {}]   ;;  %s2183_s4 = inlined_call_operand.vmem [shape: f32[4,1], index: 4, kind: input, shape index: {}]   ;;  %s2184_s5 = inlined_call_operand.vmem [shape: f32[2,4,256], index: 5, kind: output, shape index: {}]  }
   0x1 LB: > { %s1613_s19 = sadd.s32 4294967295, %s1803_s18   ;;  %p1617_p0 = scmp.ge.s32.totalorder %s1803_s18, 1  ;;  %s1803_s18 = sphi %s1840_s18, %s15_s18  }
   0x2   : > { %p187_p1 = scmp.lt.s32.totalorder %s1803_s18, 3 }
   0x4   : > { %p188_p2 = pnand %p1617_p0, %p187_p1 }
   0x5   : > { %p215_p3 = scmp.lt.s32.totalorder (!%p188_p2), %s1613_s19, 1  ;;  %s1805_s24 = smov (!%p188_p2), 112  }
   0x6   : > { %191 = sbr.rel (%p188_p2) target bundleno = 1588 (0x634), region = 40  ;;  %s1806_s25 = smov (!%p188_p2), 16  }
   0x7   : > { %s1808_s26 = smov (!%p188_p2), 127   ;;  %s1809_s27 = smov (!%p188_p2), 1  }
   0xb   : > { %s2186_s19 = smov (!%p215_p3, %s1613_s19), 1  ;;  %v1807_v3 = vmov 0   ;;  %vm332_vm0 = vcmask 130048   ;;  %vm369_vm1 = vcmask 1041408   ;;  %vm716_vm2 = vcmask 916480  }
   0xc   : > { %s1705_s20 = sshll.u32 %s2186_s19, 3  ;;  %408 = vmatprep.mubr.bf16.mxu0 %v1807_v3  ;;  %458 = vmatprep.mubr.bf16.mxu1 %v1807_v3  ;;  %v1651_v15 = vld [vmem:[%s2180_s1 + $0x2] sm:$0x3]  ;;  %vm365_vm3 = vcmask 31744   ;;  %v226_v20 = vlaneseq }
   0xd   : > { %s219_s23 = scalar_lea.vmem %s2179_s0, %s1705_s20  ;;  %1755 = vset.pattern.permute.xlu1 %v1807_v3  ;;  %1791 = vset.pattern.permute.xlu0 %v1807_v3  ;;  %v911_v19 = vld [vmem:[%s2181_s2] sm:$0xf] }
   0xe   : > { %v1856_v0 = vld [vmem:[%s219_s23] sm:$0xff]  ;;  %v227_v21 = vand.u32 127, %v226_v20 }
   0xf   : > { %324 = vrot.lane.b32.xlu0 %v1856_v0, %s1805_s24  ;;  %v1862_v1 = vcombine.high %v1856_v0, %v1856_v0  ;;  %v602_v58 = vpack.c.bf16 %v1856_v0, %v1856_v0 }
  0x10   : > { %v228_v22 = vadd.s32 128, %v227_v21  ;;  %v1622_v24 = vadd.s32 4294967280, %v227_v21  ;;  %vm229_vm5 = vcmp.ge.s32.totalorder %v227_v21, 16  ;;  %v1624_v26 = vadd.s32 4294967264, %v227_v21 }
  0x11   : > { %714 = vrot.lane.b32.xlu1 %v1862_v1, %s1805_s24  ;;  %v1720_v2 = vpack.i.bf16 %v1862_v1, %v1856_v0  ;;  %vm235_vm7 = vcmp.ge.s32.totalorder %v227_v21, 32  ;;  %v1626_v30 = vadd.s32 4294967248, %v227_v21  ;;  %vm241_vm9 = vcmp.ge.s32.totalorder %v227_v21, 48 }
  0x12   : > { %v1638_v23 = vadd.s32 4294967152, %v228_v22  ;;  %vm277_vm4 = vcmp.ge.s32.totalorder %v228_v22, 144  ;;  %v1640_v25 = vadd.s32 4294967136, %v228_v22  ;;  %vm283_vm6 = vcmp.ge.s32.totalorder %v228_v22, 160 }
  0x13   : > { %1721 = vrot.lane.b32.xlu0 %v1720_v2, %s1806_s25  ;;  %v233_v28 = vsel %vm229_vm5, %v1622_v24, %v227_v21  ;;  %v1642_v29 = vadd.s32 4294967120, %v228_v22  ;;  %vm289_vm8 = vcmp.ge.s32.totalorder %v228_v22, 176  ;;  %v1644_v33 = vadd.s32 4294967104, %v228_v22 }
  0x14   : > { %v281_v27 = vsel %vm277_vm4, %v1638_v23, %v227_v21  ;;  %v239_v32 = vsel %vm235_vm7, %v1624_v26, %v233_v28  ;;  %v1628_v34 = vadd.s32 4294967232, %v227_v21  ;;  %vm295_vm10 = vcmp.ge.s32.totalorder %v228_v22, 192 }
  0x15   : > { %v287_v31 = vsel %vm283_vm6, %v1640_v25, %v281_v27  ;;  %v245_v36 = vsel %vm241_vm9, %v1626_v30, %v239_v32  ;;  %vm247_vm11 = vcmp.ge.s32.totalorder %v227_v21, 64  ;;  %v1646_v37 = vadd.s32 4294967088, %v228_v22  ;;  %v1656_v32 = vld [vmem:[%s2180_s1 + $0x4] sm:$0x3] }
  0x16   : > { %v293_v35 = vsel %vm289_vm8, %v1642_v29, %v287_v31  ;;  %v1630_v38 = vadd.s32 4294967216, %v227_v21  ;;  %vm301_vm12 = vcmp.ge.s32.totalorder %v228_v22, 208  ;;  %v251_v40 = vsel %vm247_vm11, %v1628_v34, %v245_v36  ;;  %v358_v31 = vld [vmem:[%s2180_s1] sm:$0x3] }
  0x17   : > { %v299_v39 = vsel %vm295_vm10, %v1644_v33, %v293_v35  ;;  %vm253_vm13 = vcmp.ge.s32.totalorder %v227_v21, 80  ;;  %v1648_v41 = vadd.s32 4294967072, %v228_v22  ;;  %v1632_v42 = vadd.s32 4294967200, %v227_v21 }
  0x18   : > { %v305_v43 = vsel %vm301_vm12, %v1646_v37, %v299_v39  ;;  %vm307_vm14 = vcmp.ge.s32.totalorder %v228_v22, 224  ;;  %v257_v44 = vsel %vm253_vm13, %v1630_v38, %v251_v40  ;;  %vm259_vm15 = vcmp.ge.s32.totalorder %v227_v21, 96 }
  0x19   : > { %v1650_v45 = vadd.s32 4294967056, %v228_v22  ;;  %v1634_v46 = vadd.s32 4294967184, %v227_v21  ;;  %v311_v47 = vsel %vm307_vm14, %v1648_v41, %v305_v43  ;;  %vm313_vm4 = vcmp.ge.s32.totalorder %v228_v22, 240 }
  0x1a   : > { %v263_v48 = vsel %vm259_vm15, %v1632_v42, %v257_v44  ;;  %vm265_vm5 = vcmp.ge.s32.totalorder %v227_v21, 112  ;;  %vm351_vm6 = vcmask 1039360   ;;  %vm342_vm7 = vcmask 7168  }
  0x1b   : > { %v1909_v49 = vsel %vm313_vm4, %v1650_v45, %v311_v47  ;;  %v1911_v50 = vsel %vm265_vm5, %v1634_v46, %v263_v48  ;;  %v603_v57 = vpack.c.bf16 %v1862_v1, %v1862_v1  ;;  %v608_v35 = vsel %vm369_vm1, %v602_v58, 0 }
  0x1c   : > { %vm319_vm8 = vcmp.eq.s32.totalorder %v1909_v49, 0  ;;  %vm321_vm9 = vcmp.eq.s32.totalorder %v1909_v49, 15  ;;  %vm318_vm10 = vcmp.eq.s32.totalorder %v1911_v50, 0  ;;  %vm320_vm11 = vcmp.eq.s32.totalorder %v1911_v50, 15 }
  0x1d   : > { %vm919_vm12 = vcmask 1043456  }
  0x81   : > { %v325_v4 = vpop.permute.xlu0 %324 }
  0x83   : > { %v715_v14 = vpop.permute.xlu1 %714 }
  0x84   : > { %v1898_v17 = vsel %vm716_vm2, %v325_v4, %v715_v14 }
  0x85   : > { %v1722_v5 = vpop.permute.xlu0 %1721 }
  0x86   : > { %v1724_v6 = vunpack.i.h.bf16 %v1722_v5  ;;  %v1723_v7 = vunpack.i.l.bf16 %v1722_v5 }
  0x88   : > { %v1874_v8 = vsel %vm332_vm0, %v1723_v7, %v1724_v6  ;;  %v1877_v9 = vsel %vm332_vm0, %v325_v4, %v1723_v7  ;;  %v1893_v16 = vsel %vm716_vm2, %v715_v14, %v1724_v6 }
  0x89   : > { %v1730_v10 = vpack.i.bf16 %v1874_v8, %v1877_v9  ;;  %v364_v11 = vpack.c.bf16 %v1874_v8, %v1874_v8  ;;  %v363_v12 = vpack.c.bf16 %v1877_v9, %v1877_v9  ;;  %v1750_v18 = vpack.i.bf16 %v1893_v16, %v1898_v17 }
  0x8b   : > { %1731 = vrot.lane.b32.xlu0 %v1730_v10, %s1808_s26  ;;  %1726 = vrot.lane.b32.xlu1 %v1730_v10, %s1809_s27  ;;  %v371_v13 = vsel %vm369_vm1, %v363_v12, 0 }
  0x8c   : > { %1652 = vmatprep.subr.msk.bf16.mxu0 %vm369_vm1, %v364_v11 }
  0x8d   : > { %391 = vmatpush1.bf16.msra.mxu0 %v371_v13 }
  0x8f   : > { %1741 = vrot.lane.b32.xlu0 %v1720_v2, %s1808_s26  ;;  %1736 = vrot.lane.b32.xlu1 %v1720_v2, %s1809_s27 }
  0x90   : > { %1653 = vmatmul.mubr.msk.bf16.vlgmr.msra.gmra.mxu0 %vm365_vm3, %v1651_v15 }
  0x91   : > { %514 = vmatprep.mubr.bf16.mxu0 %v1807_v3 }
  0x93   : > { %1751 = vrot.lane.b32.xlu0 %v1750_v18, %s1808_s26  ;;  %1746 = vrot.lane.b32.xlu1 %v1750_v18, %s1809_s27 }
  0x97   : > { %914 = vperm.xlu1 %1755, %v911_v19  }
  0xfd   : > { %v1732_v51 = vpop.permute.xlu0 %1731  ;;  %v1727_v52 = vpop.permute.xlu1 %1726 }
  0xfe   : > { %v1734_v53 = vunpack.i.h.bf16 %v1732_v51  ;;  %v1733_v54 = vunpack.i.l.bf16 %v1732_v51  ;;  %v1729_v55 = vunpack.i.h.bf16 %v1727_v52  ;;  %v1728_v56 = vunpack.i.l.bf16 %v1727_v52  ;;  %v1659_v51 = vld [vmem:[%s2180_s1 + $0x6] sm:$0x3]  ;;  %v1662_v52 = vld [vmem:[%s2180_s1 + $0x8] sm:$0x3] }
 0x100   : > { %v343_v59 = vsel %vm342_vm7, %v1728_v56, %v1729_v55  ;;  %v355_v60 = vsel %vm351_vm6, %v1734_v53, %v1874_v8  ;;  %v346_v61 = vsel %vm342_vm7, %v1877_v9, %v1728_v56  ;;  %v352_v62 = vsel %vm351_vm6, %v1733_v54, %v1734_v53 }
 0x101   : > { %v1742_v63 = vpop.permute.xlu0 %1741  ;;  %v1737_v2 = vpop.permute.xlu1 %1736  ;;  %v357_v4 = vsel %vm319_vm8, %v355_v60, %v343_v59  ;;  %v468_v5 = vsel %vm321_vm9, %v343_v59, %v355_v60  ;;  %v356_v6 = vsel %vm318_vm10, %v352_v62, %v346_v61  ;;  %v467_v7 = vsel %vm320_vm11, %v346_v61, %v352_v62  ;;  %v1668_v61 = vld [vmem:[%s2180_s1 + $0xc] sm:$0x3] }
 0x102   : > { %v1744_v8 = vunpack.i.h.bf16 %v1742_v63  ;;  %v1743_v10 = vunpack.i.l.bf16 %v1742_v63  ;;  %v1739_v11 = vunpack.i.h.bf16 %v1737_v2  ;;  %v1738_v9 = vunpack.i.l.bf16 %v1737_v2  ;;  %v1674_v2 = vld [vmem:[%s2180_s1 + $0x10] sm:$0x3] }
 0x103   : > { %v360_v12 = vpack.c.bf16 %v357_v4, %v357_v4  ;;  %v472_v13 = vpack.c.bf16 %v468_v5, %v468_v5  ;;  %v359_v14 = vpack.c.bf16 %v356_v6, %v356_v6  ;;  %v471_v15 = vpack.c.bf16 %v467_v7, %v467_v7 }
 0x104   : > { %v541_v18 = vsel %vm351_vm6, %v1744_v8, %v1862_v1  ;;  %v537_v19 = vsel %vm351_vm6, %v1743_v10, %v1744_v8  ;;  %v529_v20 = vsel %vm342_vm7, %v1738_v9, %v1739_v11  ;;  %v532_v21 = vsel %vm342_vm7, %v1856_v0, %v1738_v9 }
 0x105   : > { %1654 = vmatprep.subr.msk.bf16.mxu1 %vm369_vm1, %v360_v12  ;;  %1657 = vmatprep.subr.msk.bf16.mxu0 %vm369_vm1, %v472_v13  ;;  %v1752_v22 = vpop.permute.xlu0 %1751  ;;  %v1747_v23 = vpop.permute.xlu1 %1746  ;;  %v421_v24 = vsel %vm369_vm1, %v359_v14, 0  ;;  %v477_v25 = vsel %vm369_vm1, %v471_v15, 0  ;;  %v543_v1 = vsel %vm319_vm8, %v541_v18, %v529_v20  ;;  %v542_v26 = vsel %vm318_vm10, %v537_v19, %v532_v21 }
 0x106   : > { %v1754_v27 = vunpack.i.h.bf16 %v1752_v22  ;;  %v1753_v28 = vunpack.i.l.bf16 %v1752_v22  ;;  %v1749_v29 = vunpack.i.h.bf16 %v1747_v23  ;;  %v1748_v30 = vunpack.i.l.bf16 %v1747_v23  ;;  %441 = vmatpush1.bf16.msra.mxu1 %v421_v24  ;;  %497 = vmatpush1.bf16.msra.mxu0 %v477_v25 }
 0x107   : > { %v547_v33 = vpack.c.bf16 %v543_v1, %v543_v1  ;;  %1663 = vmatprep.subr.msk.bf16.mxu0 %vm369_vm1, %v603_v57  ;;  %v546_v34 = vpack.c.bf16 %v542_v26, %v542_v26  ;;  %v657_v36 = vsel %vm321_vm9, %v529_v20, %v541_v18  ;;  %v656_v45 = vsel %vm320_vm11, %v532_v21, %v537_v19 }
 0x108   : > { %v738_v37 = vsel %vm351_vm6, %v1754_v27, %v1893_v16  ;;  %v735_v38 = vsel %vm351_vm6, %v1753_v28, %v1754_v27  ;;  %v727_v39 = vsel %vm342_vm7, %v1748_v30, %v1749_v29  ;;  %v730_v40 = vsel %vm342_vm7, %v1898_v17, %v1748_v30 }
 0x109   : > { %1655 = vmatmul.mubr.msk.bf16.vlgmr.msra.gmra.mxu1 %vm365_vm3, %v358_v31  ;;  %1658 = vmatmul.mubr.msk.bf16.vlgmr.msra.gmra.mxu0 %vm365_vm3, %v1656_v32  ;;  %v552_v41 = vsel %vm369_vm1, %v546_v34, 0  ;;  %v661_v42 = vpack.c.bf16 %v657_v36, %v657_v36  ;;  %v740_v43 = vsel %vm319_vm8, %v738_v37, %v727_v39  ;;  %v739_v46 = vsel %vm318_vm10, %v735_v38, %v730_v40 }
 0x10a   : > { %1660 = vmatprep.subr.msk.bf16.mxu1 %vm369_vm1, %v547_v33  ;;  %628 = vmatpush1.bf16.msra.mxu0 %v608_v35  ;;  %v744_v44 = vpack.c.bf16 %v740_v43, %v740_v43  ;;  %v660_v47 = vpack.c.bf16 %v656_v45, %v656_v45  ;;  %v743_v48 = vpack.c.bf16 %v739_v46, %v739_v46 }
 0x10b   : > { %572 = vmatpush1.bf16.msra.mxu1 %v552_v41  ;;  %589 = vmatprep.mubr.bf16.mxu1 %v1807_v3  ;;  %v854_v53 = vsel %vm321_vm9, %v727_v39, %v738_v37  ;;  %v800_v56 = vpack.c.bf16 %v1893_v16, %v1893_v16  ;;  %v853_v58 = vsel %vm320_vm11, %v730_v40, %v735_v38  ;;  %v1665_v16 = vld [vmem:[%s2180_s1 + $0xa] sm:$0x3] }
 0x10c   : > { %1666 = vmatprep.subr.msk.bf16.mxu1 %vm369_vm1, %v661_v42  ;;  %1669 = vmatprep.subr.msk.bf16.mxu0 %vm369_vm1, %v744_v44  ;;  %v666_v54 = vsel %vm369_vm1, %v660_v47, 0  ;;  %v749_v55 = vsel %vm369_vm1, %v743_v48, 0  ;;  %v858_v57 = vpack.c.bf16 %v854_v53, %v854_v53  ;;  %v799_v59 = vpack.c.bf16 %v1898_v17, %v1898_v17  ;;  %v1671_v17 = vld [vmem:[%s2180_s1 + $0xe] sm:$0x3] }
 0x10d   : > { %645 = vmatprep.mubr.bf16.mxu0 %v1807_v3  ;;  %v857_v60 = vpack.c.bf16 %v853_v58, %v853_v58 }
 0x10e   : > { %v805_v62 = vsel %vm369_vm1, %v799_v59, 0 }
 0x10f   : > { %v863_v63 = vsel %vm369_vm1, %v857_v60, 0 }
 0x111   : > { %1661 = vmatmul.mubr.msk.bf16.vlgmr.msra.gmra.mxu1 %vm365_vm3, %v1659_v51  ;;  %1664 = vmatmul.mubr.msk.bf16.vlgmr.msra.gmra.mxu0 %vm365_vm3, %v1662_v52 }
 0x112   : > { %686 = vmatpush1.bf16.msra.mxu1 %v666_v54  ;;  %769 = vmatpush1.bf16.msra.mxu0 %v749_v55  ;;  %v915_v48 = vpop.permute.xlu1 %914 }
 0x113   : > { %1672 = vmatprep.subr.msk.bf16.mxu1 %vm369_vm1, %v800_v56  ;;  %1675 = vmatprep.subr.msk.bf16.mxu0 %vm369_vm1, %v858_v57 }
 0x114   : > { %703 = vmatprep.mubr.bf16.mxu1 %v1807_v3  ;;  %786 = vmatprep.mubr.bf16.mxu0 %v1807_v3 }
 0x119   : > { %1667 = vmatmul.mubr.msk.bf16.vlgmr.msra.gmra.mxu1 %vm365_vm3, %v1665_v16  ;;  %1670 = vmatmul.mubr.msk.bf16.vlgmr.msra.gmra.mxu0 %vm365_vm3, %v1668_v61 }
 0x11a   : > { %825 = vmatpush1.bf16.msra.mxu1 %v805_v62  ;;  %883 = vmatpush1.bf16.msra.mxu0 %v863_v63 }
 0x11b   : > { %842 = vmatprep.mubr.bf16.mxu1 %v1807_v3  ;;  %900 = vmatprep.mubr.bf16.mxu0 %v1807_v3 }
 0x121   : > { %1673 = vmatmul.mubr.msk.bf16.vlgmr.msra.gmra.mxu1 %vm365_vm3, %v1671_v17  ;;  %1676 = vmatmul.mubr.msk.bf16.vlgmr.msra.gmra.mxu0 %vm365_vm3, %v1674_v2 }
 0x122   : > { %1023 = vmatprep.mubr.bf16.mxu1 %v1807_v3  ;;  %1073 = vmatprep.mubr.bf16.mxu0 %v1807_v3 }
 0x150   : > { %v410_v4 = vpop.f32.mrf.mxu0 }
 0x152   : > { %v412_v5 = vpop.f32.mrf.mxu0 }
 0x154   : > { %v414_v6 = vpop.f32.mrf.mxu0 }
 0x156   : > { %v415_v7 = vpop.f32.mrf.mxu0 }
 0x1c9   : > { %v460_v8 = vpop.f32.mrf.mxu1  ;;  %v516_v10 = vpop.f32.mrf.mxu0 }
 0x1ca   : > { %v461_v18 = vadd.f32 %v460_v8, %v410_v4 }
 0x1cb   : > { %v462_v11 = vpop.f32.mrf.mxu1  ;;  %v518_v9 = vpop.f32.mrf.mxu0 }
 0x1cc   : > { %v463_v21 = vadd.f32 %v462_v11, %v412_v5  ;;  %v523_v24 = vadd.f32 %v516_v10, %v461_v18 }
 0x1cd   : > { %v464_v12 = vpop.f32.mrf.mxu1  ;;  %v520_v13 = vpop.f32.mrf.mxu0 }
 0x1ce   : > { %v524_v26 = vadd.f32 %v518_v9, %v463_v21 }
 0x1cf   : > { %v465_v14 = vpop.f32.mrf.mxu1  ;;  %v521_v15 = vpop.f32.mrf.mxu0 }
 0x1d1   : > { %v591_v19 = vpop.f32.mrf.mxu1  ;;  %v647_v20 = vpop.f32.mrf.mxu0 }
 0x1d2   : > { %v598_v27 = vadd.f32 %v591_v19, %v523_v24 }
 0x1d3   : > { %v593_v22 = vpop.f32.mrf.mxu1  ;;  %v649_v23 = vpop.f32.mrf.mxu0 }
 0x1d4   : > { %v599_v30 = vadd.f32 %v593_v22, %v524_v26  ;;  %v654_v33 = vadd.f32 %v647_v20, %v598_v27 }
 0x1d5   : > { %v595_v25 = vpop.f32.mrf.mxu1  ;;  %v651_v1 = vpop.f32.mrf.mxu0 }
 0x1d6   : > { %v655_v36 = vadd.f32 %v649_v23, %v599_v30 }
 0x1d7   : > { %v596_v28 = vpop.f32.mrf.mxu1  ;;  %v652_v29 = vpop.f32.mrf.mxu0 }
 0x1d9   : > { %v705_v31 = vpop.f32.mrf.mxu1  ;;  %v788_v32 = vpop.f32.mrf.mxu0 }
 0x1da   : > { %v712_v37 = vadd.f32 %v705_v31, %v654_v33 }
 0x1db   : > { %v707_v34 = vpop.f32.mrf.mxu1  ;;  %v790_v35 = vpop.f32.mrf.mxu0 }
 0x1dc   : > { %v713_v40 = vadd.f32 %v707_v34, %v655_v36  ;;  %v795_v43 = vadd.f32 %v788_v32, %v712_v37  ;;  %v1677_v32 = vld [vmem:[%s2182_s3 + $0x2] sm:$0x3] }
 0x1dd   : > { %v709_v38 = vpop.f32.mrf.mxu1  ;;  %v792_v39 = vpop.f32.mrf.mxu0  ;;  %v1524_v36 = vld [vmem:[%s2183_s4] sm:$0xf] }
 0x1de   : > { %v796_v46 = vadd.f32 %v790_v35, %v713_v40 }
 0x1df   : > { %v710_v41 = vpop.f32.mrf.mxu1  ;;  %v793_v42 = vpop.f32.mrf.mxu0 }
 0x1e1   : > { %v844_v44 = vpop.f32.mrf.mxu1  ;;  %v902_v45 = vpop.f32.mrf.mxu0 }
 0x1e2   : > { %v851_v47 = vadd.f32 %v844_v44, %v795_v43 }
 0x1e3   : > { %v846_v51 = vpop.f32.mrf.mxu1  ;;  %v904_v52 = vpop.f32.mrf.mxu0 }
 0x1e4   : > { %v909_v53 = vadd.f32 %v902_v45, %v851_v47  ;;  %v852_v54 = vadd.f32 %v846_v51, %v796_v46 }
 0x1e5   : > { %v848_v55 = vpop.f32.mrf.mxu1  ;;  %v906_v56 = vpop.f32.mrf.mxu0 }
 0x1e6   : > { %v910_v57 = vadd.f32 %v904_v52, %v852_v54  ;;  %v917_v58 = vadd.f32 %v915_v48, %v909_v53 }
 0x1e7   : > { %v849_v59 = vpop.f32.mrf.mxu1  ;;  %v907_v60 = vpop.f32.mrf.mxu0 }
 0x1e8   : > { %v918_v16 = vadd.f32 %v915_v48, %v910_v57  ;;  %v920_v61 = vsel %vm919_vm12, %v917_v58, 0.0 }
 0x1ea   : > { %v921_v62 = vsel %vm919_vm12, %v918_v16, 0.0 }
 0x1eb   : > { %v922_v63 = vadd.f32 %v921_v62, %v920_v61 }
 0x1ed   : > { %923 = vadd.xlane.f32.xlu0 %v922_v63 }
 0x276   : > { %v924_v17 = vpop.xlane.xlu0 %923 }
 0x277   : > { %v926_v2 = vmul.f32 0.00390625, %v924_v17 }
 0x279   : > { %v927_v4 = vsub.f32 %v917_v58, %v926_v2  ;;  %v928_v5 = vsub.f32 %v918_v16, %v926_v2 }
 0x27b   : > { %v929_v6 = vmul.f32 %v927_v4, %v927_v4  ;;  %v930_v7 = vmul.f32 %v928_v5, %v928_v5 }
 0x27d   : > { %v931_v8 = vsel %vm919_vm12, %v929_v6, 0.0  ;;  %v932_v10 = vsel %vm919_vm12, %v930_v7, 0.0 }
 0x27e   : > { %v933_v11 = vadd.f32 %v932_v10, %v931_v8 }
 0x280   : > { %934 = vadd.xlane.f32.xlu1 %v933_v11 }
 0x309   : > { %v935_v9 = vpop.xlane.xlu1 %934 }
 0x30a   : > { %v936_v12 = vmul.f32 0.00390625, %v935_v9 }
 0x30c   : > { %v937_v13 = vadd.f32 1e-05, %v936_v12 }
 0x30e   : > { %1793 = vrsqrt.f32 %v937_v13 }
 0x31b   : > { %v1794_v14 = vpop.eup %1793 }
 0x31c   : > { %v939_v15 = vmul.f32 %v1794_v14, %v927_v4  ;;  %v940_v18 = vmul.f32 %v1794_v14, %v928_v5 }
 0x31e   : > { %v2027_v19 = vmax.f32 %v939_v15, 0.0  ;;  %v2029_v20 = vmax.f32 %v940_v18, 0.0  ;;  %v975_v18 = vld [vmem:[%s2182_s3] sm:$0x3] }
 0x320   : > { %944 = vrot.lane.b32.xlu0 %v2027_v19, %s1805_s24  ;;  %v1756_v21 = vpack.i.bf16 %v2029_v20, %v2027_v19  ;;  %v1217_v48 = vpack.c.bf16 %v2029_v20, %v2029_v20 }
 0x322   : > { %1757 = vrot.lane.b32.xlu1 %v1756_v21, %s1806_s25 }
 0x324   : > { %1328 = vrot.lane.b32.xlu0 %v2029_v20, %s1805_s24  ;;  %s224_s24 = scalar_lea.vmem %s2184_s5, %s1705_s20 }
 0x392   : > { %v945_v22 = vpop.permute.xlu0 %944 }
 0x394   : > { %v1758_v23 = vpop.permute.xlu1 %1757 }
 0x395   : > { %v1760_v24 = vunpack.i.h.bf16 %v1758_v23  ;;  %v1759_v25 = vunpack.i.l.bf16 %v1758_v23  ;;  %v1682_v23 = vld [vmem:[%s2182_s3 + $0x4] sm:$0x3] }
 0x396   : > { %v1329_v30 = vpop.permute.xlu0 %1328 }
 0x397   : > { %v952_v1 = vsel %vm332_vm0, %v1759_v25, %v1760_v24  ;;  %v955_v26 = vsel %vm332_vm0, %v945_v22, %v1759_v25  ;;  %v2048_v33 = vsel %vm716_vm2, %v945_v22, %v1329_v30  ;;  %v2051_v34 = vsel %vm716_vm2, %v1329_v30, %v1760_v24 }
 0x398   : > { %v981_v27 = vpack.c.bf16 %v952_v1, %v952_v1  ;;  %v1766_v28 = vpack.i.bf16 %v952_v1, %v955_v26  ;;  %v980_v29 = vpack.c.bf16 %v955_v26, %v955_v26  ;;  %v1786_v35 = vpack.i.bf16 %v2051_v34, %v2048_v33 }
 0x39a   : > { %1678 = vmatprep.subr.msk.bf16.mxu1 %vm369_vm1, %v981_v27  ;;  %1767 = vrot.lane.b32.xlu0 %v1766_v28, %s1808_s26  ;;  %v986_v31 = vsel %vm369_vm1, %v980_v29, 0 }
 0x39b   : > { %1762 = vrot.lane.b32.xlu1 %v1766_v28, %s1809_s27  ;;  %1006 = vmatpush1.bf16.msra.mxu1 %v986_v31 }
 0x39e   : > { %1777 = vrot.lane.b32.xlu0 %v1756_v21, %s1808_s26  ;;  %1679 = vmatmul.mubr.msk.bf16.vlgmr.msra.gmra.mxu1 %vm365_vm3, %v1677_v32 }
 0x39f   : > { %1772 = vrot.lane.b32.xlu1 %v1756_v21, %s1809_s27  ;;  %1129 = vmatprep.mubr.bf16.mxu1 %v1807_v3  ;;  %v1216_v21 = vpack.c.bf16 %v2027_v19, %v2027_v19 }
 0x3a1   : > { %v1222_v30 = vsel %vm369_vm1, %v1216_v21, 0 }
 0x3a2   : > { %1787 = vrot.lane.b32.xlu0 %v1786_v35, %s1808_s26 }
 0x3a3   : > { %1782 = vrot.lane.b32.xlu1 %v1786_v35, %s1809_s27 }
 0x3a7   : > { %1527 = vperm.xlu1 %1755, %v1524_v36   ;;  %v1685_v36 = vld [vmem:[%s2182_s3 + $0x6] sm:$0x3] }
 0x40c   : > { %v1768_v37 = vpop.permute.xlu0 %1767 }
 0x40d   : > { %v1763_v38 = vpop.permute.xlu1 %1762  ;;  %v1770_v39 = vunpack.i.h.bf16 %v1768_v37  ;;  %v1769_v40 = vunpack.i.l.bf16 %v1768_v37 }
 0x40e   : > { %v1765_v41 = vunpack.i.h.bf16 %v1763_v38  ;;  %v1764_v42 = vunpack.i.l.bf16 %v1763_v38  ;;  %v1688_v38 = vld [vmem:[%s2182_s3 + $0x8] sm:$0x3] }
 0x40f   : > { %v972_v43 = vsel %vm351_vm6, %v1770_v39, %v952_v1  ;;  %v969_v46 = vsel %vm351_vm6, %v1769_v40, %v1770_v39  ;;  %v1413_v40 = vpack.c.bf16 %v2051_v34, %v2051_v34 }
 0x410   : > { %v961_v44 = vsel %vm342_vm7, %v1764_v42, %v1765_v41  ;;  %v964_v45 = vsel %vm342_vm7, %v955_v26, %v1764_v42  ;;  %v1778_v47 = vpop.permute.xlu0 %1777 }
 0x411   : > { %v1773_v51 = vpop.permute.xlu1 %1772  ;;  %v1780_v52 = vunpack.i.h.bf16 %v1778_v47  ;;  %v1779_v53 = vunpack.i.l.bf16 %v1778_v47  ;;  %v974_v54 = vsel %vm319_vm8, %v972_v43, %v961_v44  ;;  %v1083_v55 = vsel %vm321_vm9, %v961_v44, %v972_v43  ;;  %v1691_v44 = vld [vmem:[%s2182_s3 + $0xa] sm:$0x3] }
 0x412   : > { %v1775_v56 = vunpack.i.h.bf16 %v1773_v51  ;;  %v1774_v57 = vunpack.i.l.bf16 %v1773_v51  ;;  %v977_v58 = vpack.c.bf16 %v974_v54, %v974_v54  ;;  %v1087_v59 = vpack.c.bf16 %v1083_v55, %v1083_v55 }
 0x413   : > { %v1155_v60 = vsel %vm351_vm6, %v1780_v52, %v2029_v20  ;;  %v1152_v16 = vsel %vm351_vm6, %v1779_v53, %v1780_v52  ;;  %v973_v61 = vsel %vm318_vm10, %v969_v46, %v964_v45  ;;  %v1082_v62 = vsel %vm320_vm11, %v964_v45, %v969_v46  ;;  %v1694_v46 = vld [vmem:[%s2182_s3 + $0xc] sm:$0x3] }
 0x414   : > { %v1144_v63 = vsel %vm342_vm7, %v1774_v57, %v1775_v56  ;;  %v1147_v17 = vsel %vm342_vm7, %v2027_v19, %v1774_v57  ;;  %1680 = vmatprep.subr.msk.bf16.mxu0 %vm369_vm1, %v977_v58  ;;  %1683 = vmatprep.subr.msk.bf16.mxu1 %vm369_vm1, %v1087_v59  ;;  %v1788_v2 = vpop.permute.xlu0 %1787  ;;  %v976_v4 = vpack.c.bf16 %v973_v61, %v973_v61 }
 0x415   : > { %v1783_v5 = vpop.permute.xlu1 %1782  ;;  %v1790_v6 = vunpack.i.h.bf16 %v1788_v2  ;;  %v1789_v7 = vunpack.i.l.bf16 %v1788_v2  ;;  %v1086_v8 = vpack.c.bf16 %v1082_v62, %v1082_v62  ;;  %v1157_v10 = vsel %vm319_vm8, %v1155_v60, %v1144_v63 }
 0x416   : > { %v1785_v11 = vunpack.i.h.bf16 %v1783_v5  ;;  %v1784_v9 = vunpack.i.l.bf16 %v1783_v5  ;;  %v1036_v12 = vsel %vm369_vm1, %v976_v4, 0  ;;  %v1161_v13 = vpack.c.bf16 %v1157_v10, %v1157_v10 }
 0x417   : > { %v1351_v14 = vsel %vm351_vm6, %v1790_v6, %v2051_v34  ;;  %1056 = vmatpush1.bf16.msra.mxu0 %v1036_v12  ;;  %v1092_v15 = vsel %vm369_vm1, %v1086_v8, 0  ;;  %v1156_v20 = vsel %vm318_vm10, %v1152_v16, %v1147_v17  ;;  %v1348_v1 = vsel %vm351_vm6, %v1789_v7, %v1790_v6 }
 0x418   : > { %v1340_v22 = vsel %vm342_vm7, %v1784_v9, %v1785_v11  ;;  %1112 = vmatpush1.bf16.msra.mxu1 %v1092_v15  ;;  %1686 = vmatprep.subr.msk.bf16.mxu0 %vm369_vm1, %v1161_v13  ;;  %v1160_v24 = vpack.c.bf16 %v1156_v20, %v1156_v20  ;;  %v1343_v25 = vsel %vm342_vm7, %v2048_v33, %v1784_v9 }
 0x419   : > { %1689 = vmatprep.subr.msk.bf16.mxu1 %vm369_vm1, %v1217_v48  ;;  %v1271_v19 = vsel %vm321_vm9, %v1144_v63, %v1155_v60  ;;  %v1353_v26 = vsel %vm319_vm8, %v1351_v14, %v1340_v22  ;;  %v1270_v31 = vsel %vm320_vm11, %v1147_v17, %v1152_v16  ;;  %v1352_v32 = vsel %vm318_vm10, %v1348_v1, %v1343_v25  ;;  %v1700_v48 = vld [vmem:[%s2182_s3 + $0x10] sm:$0x3] }
 0x41a   : > { %1681 = vmatmul.mubr.msk.bf16.vlgmr.msra.gmra.mxu0 %vm365_vm3, %v975_v18  ;;  %v1166_v27 = vsel %vm369_vm1, %v1160_v24, 0  ;;  %v1275_v28 = vpack.c.bf16 %v1271_v19, %v1271_v19  ;;  %v1357_v29 = vpack.c.bf16 %v1353_v26, %v1353_v26  ;;  %v1274_v35 = vpack.c.bf16 %v1270_v31, %v1270_v31 }
 0x41b   : > { %1684 = vmatmul.mubr.msk.bf16.vlgmr.msra.gmra.mxu1 %vm365_vm3, %v1682_v23  ;;  %1186 = vmatpush1.bf16.msra.mxu0 %v1166_v27  ;;  %v1356_v37 = vpack.c.bf16 %v1352_v32, %v1352_v32  ;;  %v1467_v39 = vsel %vm321_vm9, %v1340_v22, %v1351_v14  ;;  %v1466_v49 = vsel %vm320_vm11, %v1343_v25, %v1348_v1 }
 0x41c   : > { %1242 = vmatpush1.bf16.msra.mxu1 %v1222_v30  ;;  %1692 = vmatprep.subr.msk.bf16.mxu0 %vm369_vm1, %v1275_v28  ;;  %v1280_v41 = vsel %vm369_vm1, %v1274_v35, 0  ;;  %v1471_v43 = vpack.c.bf16 %v1467_v39, %v1467_v39  ;;  %v1412_v34 = vpack.c.bf16 %v2048_v33, %v2048_v33  ;;  %v1470_v45 = vpack.c.bf16 %v1466_v49, %v1466_v49  ;;  %v1697_v33 = vld [vmem:[%s2182_s3 + $0xe] sm:$0x3] }
 0x41d   : > { %1695 = vmatprep.subr.msk.bf16.mxu1 %vm369_vm1, %v1357_v29  ;;  %1203 = vmatprep.mubr.bf16.mxu0 %v1807_v3  ;;  %v1362_v42 = vsel %vm369_vm1, %v1356_v37, 0 }
 0x41e   : > { %1259 = vmatprep.mubr.bf16.mxu1 %v1807_v3  ;;  %v1418_v50 = vsel %vm369_vm1, %v1412_v34, 0  ;;  %v1476_v47 = vsel %vm369_vm1, %v1470_v45, 0 }
 0x422   : > { %1687 = vmatmul.mubr.msk.bf16.vlgmr.msra.gmra.mxu0 %vm365_vm3, %v1685_v36  ;;  %v1528_v37 = vpop.permute.xlu1 %1527 }
 0x423   : > { %1690 = vmatmul.mubr.msk.bf16.vlgmr.msra.gmra.mxu1 %vm365_vm3, %v1688_v38  ;;  %1300 = vmatpush1.bf16.msra.mxu0 %v1280_v41 }
 0x424   : > { %1382 = vmatpush1.bf16.msra.mxu1 %v1362_v42  ;;  %1698 = vmatprep.subr.msk.bf16.mxu0 %vm369_vm1, %v1413_v40 }
 0x425   : > { %1701 = vmatprep.subr.msk.bf16.mxu1 %vm369_vm1, %v1471_v43  ;;  %1317 = vmatprep.mubr.bf16.mxu0 %v1807_v3 }
 0x426   : > { %1399 = vmatprep.mubr.bf16.mxu1 %v1807_v3 }
 0x42a   : > { %1693 = vmatmul.mubr.msk.bf16.vlgmr.msra.gmra.mxu0 %vm365_vm3, %v1691_v44 }
 0x42b   : > { %1696 = vmatmul.mubr.msk.bf16.vlgmr.msra.gmra.mxu1 %vm365_vm3, %v1694_v46  ;;  %1438 = vmatpush1.bf16.msra.mxu0 %v1418_v50 }
 0x42c   : > { %1496 = vmatpush1.bf16.msra.mxu1 %v1476_v47  ;;  %1455 = vmatprep.mubr.bf16.mxu0 %v1807_v3 }
 0x42d   : > { %1513 = vmatprep.mubr.bf16.mxu1 %v1807_v3 }
 0x432   : > { %1699 = vmatmul.mubr.msk.bf16.vlgmr.msra.gmra.mxu0 %vm365_vm3, %v1697_v33 }
 0x433   : > { %1702 = vmatmul.mubr.msk.bf16.vlgmr.msra.gmra.mxu1 %vm365_vm3, %v1700_v48 }
 0x45e   : > { %v1025_v51 = vpop.f32.mrf.mxu1 }
 0x460   : > { %v1027_v52 = vpop.f32.mrf.mxu1 }
 0x462   : > { %v1029_v53 = vpop.f32.mrf.mxu1 }
 0x464   : > { %v1030_v54 = vpop.f32.mrf.mxu1 }
 0x4da   : > { %v1075_v55 = vpop.f32.mrf.mxu0 }
 0x4db   : > { %v1131_v56 = vpop.f32.mrf.mxu1  ;;  %v1076_v16 = vadd.f32 %v1075_v55, %v1025_v51 }
 0x4dc   : > { %v1077_v57 = vpop.f32.mrf.mxu0 }
 0x4dd   : > { %v1133_v3 = vpop.f32.mrf.mxu1  ;;  %v1078_v63 = vadd.f32 %v1077_v57, %v1027_v52  ;;  %v1138_v4 = vadd.f32 %v1131_v56, %v1076_v16 }
 0x4de   : > { %v1079_v58 = vpop.f32.mrf.mxu0 }
 0x4df   : > { %v1135_v59 = vpop.f32.mrf.mxu1  ;;  %v1139_v7 = vadd.f32 %v1133_v3, %v1078_v63 }
 0x4e0   : > { %v1080_v60 = vpop.f32.mrf.mxu0 }
 0x4e1   : > { %v1136_v61 = vpop.f32.mrf.mxu1 }
 0x4e2   : > { %v1205_v62 = vpop.f32.mrf.mxu0 }
 0x4e3   : > { %v1261_v17 = vpop.f32.mrf.mxu1  ;;  %v1212_v8 = vadd.f32 %v1205_v62, %v1138_v4 }
 0x4e4   : > { %v1207_v2 = vpop.f32.mrf.mxu0 }
 0x4e5   : > { %v1263_v5 = vpop.f32.mrf.mxu1  ;;  %v1213_v9 = vadd.f32 %v1207_v2, %v1139_v7  ;;  %v1268_v14 = vadd.f32 %v1261_v17, %v1212_v8 }
 0x4e6   : > { %v1209_v6 = vpop.f32.mrf.mxu0 }
 0x4e7   : > { %v1265_v10 = vpop.f32.mrf.mxu1  ;;  %v1269_v20 = vadd.f32 %v1263_v5, %v1213_v9 }
 0x4e8   : > { %v1210_v11 = vpop.f32.mrf.mxu0 }
 0x4e9   : > { %v1266_v12 = vpop.f32.mrf.mxu1 }
 0x4ea   : > { %v1319_v13 = vpop.f32.mrf.mxu0 }
 0x4eb   : > { %v1401_v15 = vpop.f32.mrf.mxu1  ;;  %v1326_v21 = vadd.f32 %v1319_v13, %v1268_v14 }
 0x4ec   : > { %v1321_v18 = vpop.f32.mrf.mxu0 }
 0x4ed   : > { %v1403_v22 = vpop.f32.mrf.mxu1  ;;  %v1327_v24 = vadd.f32 %v1321_v18, %v1269_v20  ;;  %v1408_v19 = vadd.f32 %v1401_v15, %v1326_v21 }
 0x4ee   : > { %v1323_v23 = vpop.f32.mrf.mxu0 }
 0x4ef   : > { %v1405_v25 = vpop.f32.mrf.mxu1  ;;  %v1409_v28 = vadd.f32 %v1403_v22, %v1327_v24 }
 0x4f0   : > { %v1324_v1 = vpop.f32.mrf.mxu0 }
 0x4f1   : > { %v1406_v26 = vpop.f32.mrf.mxu1 }
 0x4f2   : > { %v1457_v27 = vpop.f32.mrf.mxu0 }
 0x4f3   : > { %v1464_v29 = vadd.f32 %v1457_v27, %v1408_v19  ;;  %v1515_v30 = vpop.f32.mrf.mxu1 }
 0x4f4   : > { %v1459_v31 = vpop.f32.mrf.mxu0 }
 0x4f5   : > { %v1522_v32 = vadd.f32 %v1515_v30, %v1464_v29  ;;  %v1465_v35 = vadd.f32 %v1459_v31, %v1409_v28  ;;  %v1517_v36 = vpop.f32.mrf.mxu1 }
 0x4f6   : > { %v1461_v38 = vpop.f32.mrf.mxu0 }
 0x4f7   : > { %v1530_v39 = vadd.f32 %v1528_v37, %v1522_v32  ;;  %v1523_v40 = vadd.f32 %v1517_v36, %v1465_v35  ;;  %v1519_v41 = vpop.f32.mrf.mxu1 }
 0x4f8   : > { %v1462_v42 = vpop.f32.mrf.mxu0 }
 0x4f9   : > { %v1531_v43 = vadd.f32 %v1528_v37, %v1523_v40  ;;  %v1520_v49 = vpop.f32.mrf.mxu1  ;;  %v1532_v34 = vsel %vm919_vm12, %v1530_v39, 0.0 }
 0x4fb   : > { %v1533_v44 = vsel %vm919_vm12, %v1531_v43, 0.0 }
 0x4fc   : > { %v1534_v45 = vadd.f32 %v1533_v44, %v1532_v34 }
 0x4fe   : > { %1535 = vadd.xlane.f32.xlu0 %v1534_v45 }
 0x587   : > { %v1536_v46 = vpop.xlane.xlu0 %1535 }
 0x588   : > { %v1537_v50 = vmul.f32 0.00390625, %v1536_v46 }
 0x58a   : > { %v1538_v47 = vsub.f32 %v1530_v39, %v1537_v50  ;;  %v1539_v33 = vsub.f32 %v1531_v43, %v1537_v50 }
 0x58c   : > { %v1540_v48 = vmul.f32 %v1538_v47, %v1538_v47  ;;  %v1541_v51 = vmul.f32 %v1539_v33, %v1539_v33 }
 0x58e   : > { %v1542_v52 = vsel %vm919_vm12, %v1540_v48, 0.0  ;;  %v1543_v53 = vsel %vm919_vm12, %v1541_v51, 0.0 }
 0x58f   : > { %v1544_v54 = vadd.f32 %v1543_v53, %v1542_v52 }
 0x591   : > { %1545 = vadd.xlane.f32.xlu1 %v1544_v54 }
 0x61a   : > { %v1546_v55 = vpop.xlane.xlu1 %1545 }
 0x61b   : > { %v1547_v56 = vmul.f32 0.00390625, %v1546_v55 }
 0x61d   : > { %v1548_v57 = vadd.f32 1e-05, %v1547_v56 }
 0x61f   : > { %1795 = vrsqrt.f32 %v1548_v57 }
 0x62c   : > { %v1796_v3 = vpop.eup %1795 }
 0x62d   : > { %v1550_v58 = vmul.f32 %v1796_v3, %v1538_v47  ;;  %v1551_v59 = vmul.f32 %v1796_v3, %v1539_v33 }
 0x62f   : > { %v1554_v60 = vcombine.low %v1550_v58, %v1551_v59 }
 0x631   : > { %v1556_v16 = vadd.f32 %v1554_v60, %v1856_v0 }
 0x633   : > { %1557 = vst [vmem:[%s224_s24] sm:$0xff] %v1556_v16 }
 0x634 PF: > { %s15_s18 = sadd.s32 1, %s1803_s18  }
 0x635   : > { %p12_p4 = scmp.ge.s32.totalorder %s15_s18, 4  }
 0x637   :  { %14 = sbr.rel (!%p12_p4) target bundleno = 1 (0x1), region = 86 }

</bundles_post_ra>
